<compile_context>
chip_gen: v7x
topology: tpu7x:2x2x1
jax: 0.10.0
libtpu: 0.0.40
codegen_flags: <defaults>
</compile_context>

<pallas_src>
import functools

import jax
import jax.numpy as jnp
from jax import lax
from jax.experimental import pallas as pl
from jax.experimental.pallas import tpu as pltpu


# ----------------------------------------------------------------------------
# Kernel (Bt batch elements per grid step, channels-last row slabs)
# ----------------------------------------------------------------------------
def _encoder_block_kernel(
    x_ref,      # [Bt*Lp, 2*Cin]  bf16  row l' = [x[2l'], x[2l'+1]] channels-last
    cond_ref,   # [Bt*N, CD]      bf16
    w1_ref,     # [3*Cin, Cout]   bf16  conv1 taps stacked along K (l-1 | l | l+1)
    w2_ref,     # [3*Cout, Cout]  bf16  conv2 taps stacked along K
    wkv_ref,    # [CD, 2*Cout]    bf16  folded cond->K chain | cond->V chain
    wattn_ref,  # [2, Cout, Cout] bf16  Wq*scale, Wout
    vec_ref,    # [8, Cout]       f32   s1,t1,s2,t2, bq*scale, bo, bk_fold, bv_fold
    out_ref,    # [Bt*Lp, Cout]   f32
    *, Bt, Lp, N, Cin, Cout, H, Dh,
):
    f32, bf16 = jnp.float32, jnp.bfloat16
    R = Bt * Lp

    def mm(a, b):  # bf16 MXU operands, f32 accumulation
        return jnp.dot(a.astype(bf16), b, preferred_element_type=f32)

    # Conv boundary mask, generated in-kernel.  l % Lp (not the raw row index)
    # so rolled neighbours can never leak across batch boundaries in the slab.
    l_pos = lax.broadcasted_iota(jnp.int32, (R, 1), 0) % Lp
    not_first = l_pos != 0           # zero the l-1 neighbour at l == 0
    not_last = l_pos != (Lp - 1)     # zero the l+1 neighbour at l == Lp-1

    # --- MaxPool1d(2): even/odd positions packed side-by-side on lanes --------
    x = x_ref[...]
    pooled = jnp.maximum(x[:, :Cin], x[:, Cin:]).astype(f32)        # [R, Cin]

    # --- DoubleConv1D: 3-tap conv as ONE [R,3C]x[3C,Cout] matmul, BN folded ---
    def conv_bn_relu(hf, w_ref, sc, sh):
        # hf: f32 [R, C].  Rolls kept in f32 (safe 32-bit sublane rotate); the
        # concatenated taps are cast to bf16 once.
        h_m1 = jnp.where(not_first, pltpu.roll(hf, 1, axis=0), 0.0)      # h[l-1]
        h_p1 = jnp.where(not_last, pltpu.roll(hf, R - 1, axis=0), 0.0)   # h[l+1]
        taps = jnp.concatenate([h_m1, hf, h_p1], axis=-1).astype(bf16)   # [R, 3C]
        y = jnp.dot(taps, w_ref[...], preferred_element_type=f32)
        return jnp.maximum(y * sc + sh, 0.0)                             # BN+ReLU

    h = conv_bn_relu(pooled, w1_ref, vec_ref[0:1], vec_ref[1:2])
    h = conv_bn_relu(h, w2_ref, vec_ref[2:3], vec_ref[3:4])          # [R, Cout]

    # --- CrossAttention1D ------------------------------------------------------
    # Fused, pre-folded cond projections: one [Bt*N, CD] x [CD, 2*Cout] matmul.
    kv = jnp.dot(cond_ref[...], wkv_ref[...], preferred_element_type=f32)
    kp = (kv[:, :Cout] + vec_ref[6:7]).astype(bf16)                  # [Bt*N, Cout]
    vp = (kv[:, Cout:] + vec_ref[7:8]).astype(bf16)
    qp = (mm(h, wattn_ref[0]) + vec_ref[4:5]).astype(bf16)           # [R, Cout]

    def split_heads(t, T):
        # [Bt*T, H*Dh] -> [H*Bt, T, Dh]; static lane slices + free leading-dim
        # reshapes only (no in-kernel transposes).
        return jnp.concatenate(
            [t[:, i * Dh:(i + 1) * Dh].reshape(Bt, T, Dh) for i in range(H)],
            axis=0)

    qh = split_heads(qp, Lp)                                         # [H*Bt, Lp, Dh]
    kh = split_heads(kp, N)                                          # [H*Bt, N, Dh]
    vh = split_heads(vp, N)

    # Two batched matmuls + one softmax over the whole [H*Bt, Lp, N] tensor.
    s = jnp.einsum("bld,bnd->bln", qh, kh, preferred_element_type=f32)
    s = s - jnp.max(s, axis=-1, keepdims=True)
    p = jnp.exp(s)
    p = p * pl.reciprocal(jnp.sum(p, axis=-1, keepdims=True), approx=True)
    ctx = jnp.einsum("bln,bnd->bld", p.astype(bf16), vh,
                     preferred_element_type=f32)                     # [H*Bt, Lp, Dh]

    # Merge heads back to [R, Cout] (head i -> columns i*Dh:(i+1)*Dh).
    ctx = jnp.concatenate(
        [ctx[i * Bt:(i + 1) * Bt].reshape(R, Dh) for i in range(H)], axis=-1)

    attn = mm(ctx, wattn_ref[1]) + vec_ref[5:6]
    out_ref[...] = (h + attn).astype(out_ref.dtype)


# ----------------------------------------------------------------------------
# Wrapper (parameter folding / packing is plain-JAX glue done once)
# ----------------------------------------------------------------------------
def encoder_block_1d(x, cond, params, num_heads=4, batch_tile=None, row_cap=1024):
    B, Cin, L = x.shape
    _, N, CD = cond.shape
    Cout = params["conv1_w"].shape[0]
    Lp = L // 2
    H = num_heads
    Dh = Cout // H
    eps = 1e-5
    f32, bf16 = jnp.float32, jnp.bfloat16

    # Fold several batch elements into one fat row slab per grid step.
    # Default heuristic prefers the fattest slab (best for v5e/v6e single TC);
    # on v7x pass batch_tile <= B // 2 (even grid) to keep both TensorCores busy.
    if batch_tile is None:
        cands = [d for d in range(1, B + 1)
                 if B % d == 0 and d * max(Lp, N) <= row_cap
                 and (d == B or ((d * Lp) % 8 == 0 and (d * N) % 8 == 0))]
        batch_tile = max(cands) if cands else B
    Bt = batch_tile
    assert B % Bt == 0, "batch_tile must divide the batch size"
    grid = (B // Bt,)

    # Input layout: NCL -> channels-last rows, streamed bf16 (half the HBM bytes).
    x_rows = (jnp.transpose(x, (0, 2, 1))[:, :2 * Lp, :]
              .reshape(B * Lp, 2 * Cin).astype(bf16))
    cond_rows = cond.reshape(B * N, CD).astype(bf16)

    # Fold conv bias + BatchNorm (eval mode) into one scale/shift pair.
    def fold(gamma, beta, mean, var, conv_b):
        s = gamma / jnp.sqrt(var + eps)
        return s, beta + (conv_b - mean) * s

    s1, t1 = fold(params["bn1_gamma"], params["bn1_beta"],
                  params["bn1_mean"], params["bn1_var"], params["conv1_b"])
    s2, t2 = fold(params["bn2_gamma"], params["bn2_beta"],
                  params["bn2_mean"], params["bn2_var"], params["conv2_b"])

    # Conv taps stacked along K: [3*C, Cout] so the 3-tap conv is one matmul.
    w1 = jnp.transpose(params["conv1_w"], (2, 1, 0)).reshape(3 * Cin, Cout).astype(bf16)
    w2 = jnp.transpose(params["conv2_w"], (2, 1, 0)).reshape(3 * Cout, Cout).astype(bf16)

    ipw, ipb = params["in_proj_w"], params["in_proj_b"]
    scale = float(Dh) ** -0.5
    Wki, Wvi = ipw[Cout:2 * Cout], ipw[2 * Cout:]
    bki, bvi = ipb[Cout:2 * Cout], ipb[2 * Cout:]
    # Fold the two-matmul cond chains (k_proj -> in_proj_K, v_proj -> in_proj_V)
    # into single [CD, Cout] matrices, in f32, cast to bf16 once.
    a_k = params["wk"].T @ Wki.T
    a_v = params["wv"].T @ Wvi.T
    c_k = params["bk"] @ Wki.T + bki
    c_v = params["bv"] @ Wvi.T + bvi
    wkv = jnp.concatenate([a_k, a_v], axis=1).astype(bf16)            # [CD, 2*Cout]

    wattn = jnp.stack([ipw[:Cout].T * scale,                          # Wq (scaled)
                       params["out_proj_w"].T]).astype(bf16)          # [2, Cout, Cout]

    vecs = jnp.stack([s1, t1, s2, t2,
                      ipb[:Cout] * scale, params["out_proj_b"],
                      c_k, c_v]).astype(f32)                          # [8, Cout]

    kernel = functools.partial(_encoder_block_kernel, Bt=Bt, Lp=Lp, N=N,
                               Cin=Cin, Cout=Cout, H=H, Dh=Dh)
    cparams = pltpu.CompilerParams(
        dimension_semantics=("parallel",),
        vmem_limit_bytes=64 * 1024 * 1024,   # explicit; <= 64 MiB keeps v7x happy
    )
    out_shape = jax.ShapeDtypeStruct((B * Lp, Cout), f32)
    operands = (x_rows, cond_rows, w1, w2, wkv, wattn, vecs)

    def run(single_buffer_consts):
        if single_buffer_consts:
            # Constant-index weight blocks never change: single-buffer them.
            const = lambda *shp: pl.BlockSpec(shp, lambda b: (0,) * len(shp),
                                              pipeline_mode=pl.Buffered(1))
        else:
            const = lambda *shp: pl.BlockSpec(shp, lambda b: (0,) * len(shp))
        grid_spec = pltpu.PrefetchScalarGridSpec(
            num_scalar_prefetch=0,
            grid=grid,
            in_specs=[
                pl.BlockSpec((Bt * Lp, 2 * Cin), lambda b: (b, 0)),   # x rows
                pl.BlockSpec((Bt * N, CD), lambda b: (b, 0)),         # cond rows
                const(3 * Cin, Cout),                                 # conv1 taps
                const(3 * Cout, Cout),                                # conv2 taps
                const(CD, 2 * Cout),                                  # fused cond proj
                const(2, Cout, Cout),                                 # Wq*scale, Wout
                const(8, Cout),                                       # packed scale/bias
            ],
            out_specs=pl.BlockSpec((Bt * Lp, Cout), lambda b: (b, 0)),
        )
        return pl.pallas_call(kernel, out_shape=out_shape, grid_spec=grid_spec,
                              compiler_params=cparams)(*operands)

    try:
        out_rows = run(True)
    except Exception:
        # Fallback for JAX versions where pipeline_mode=pl.Buffered(1) on
        # constant-index blocks is unsupported: default double buffering.
        out_rows = run(False)

    # Back to PyTorch's [B, C, L'] (reshape is free, one transpose).
    return jnp.transpose(out_rows.reshape(B, Lp, Cout), (0, 2, 1))


# ----------------------------------------------------------------------------
# Pure-JAX reference (same math as the PyTorch module; used only for validation)
# ----------------------------------------------------------------------------
def reference_forward(x, cond, params, num_heads=4):
    B, Cin, L = x.shape
    Lp = L // 2
    Cout = params["conv1_w"].shape[0]
    eps = 1e-5

    xp = x[:, :, : 2 * Lp].reshape(B, Cin, Lp, 2).max(axis=-1)        # maxpool

    def conv1d(h, w, b):                                              # h:[B,C,Lc], w:[O,C,3]
        Lc = h.shape[-1]
        hp = jnp.pad(h, ((0, 0), (0, 0), (1, 1)))
        taps = [jnp.einsum("bcl,oc->bol", hp[:, :, k:k + Lc], w[:, :, k]) for k in range(3)]
        return sum(taps) + b[None, :, None]

    def bn(h, g, bt, m, v):
        return ((h - m[None, :, None]) / jnp.sqrt(v + eps)[None, :, None]
                * g[None, :, None] + bt[None, :, None])

    h = jax.nn.relu(bn(conv1d(xp, params["conv1_w"], params["conv1_b"]),
                       params["bn1_gamma"], params["bn1_beta"],
                       params["bn1_mean"], params["bn1_var"]))
    h = jax.nn.relu(bn(conv1d(h, params["conv2_w"], params["conv2_b"]),
                       params["bn2_gamma"], params["bn2_beta"],
                       params["bn2_mean"], params["bn2_var"]))

    q = jnp.transpose(h, (0, 2, 1))                                   # [B, Lp, dim]
    k = cond @ params["wk"].T + params["bk"]
    v = cond @ params["wv"].T + params["bv"]

    dim = Cout
    H = num_heads
    Dh = dim // H
    ipw, ipb = params["in_proj_w"], params["in_proj_b"]
    qp = q @ ipw[:dim].T + ipb[:dim]
    kp = k @ ipw[dim:2 * dim].T + ipb[dim:2 * dim]
    vp = v @ ipw[2 * dim:].T + ipb[2 * dim:]

    def heads(t):
        Bb, T, _ = t.shape
        return t.reshape(Bb, T, H, Dh).transpose(0, 2, 1, 3)

    qh = heads(qp) * (Dh ** -0.5)
    kh = heads(kp)
    vh = heads(vp)
    s = jnp.einsum("bhld,bhnd->bhln", qh, kh)
    p = jax.nn.softmax(s, axis=-1)
    o = jnp.einsum("bhln,bhnd->bhld", p, vh)
    o = o.transpose(0, 2, 1, 3).reshape(q.shape[0], q.shape[1], dim)
    o = o @ params["out_proj_w"].T + params["out_proj_b"]
    out = q + o
    return jnp.transpose(out, (0, 2, 1))                              # [B, dim, Lp]


# ----------------------------------------------------------------------------
if __name__ == "__main__":
    B, Cin, L = 2, 4, 16          # x: [B, in_ch, L]
    Cout, CD, N = 32, 16, 8       # out_ch, cond_dim, cond sequence length
    H = 4                         # num_heads (Dh = 8)

    key = jax.random.PRNGKey(0)
    ks = jax.random.split(key, 24)
    nrm = lambda k, shp, s=0.1: s * jax.random.normal(k, shp, jnp.float32)

    params = dict(
        conv1_w=nrm(ks[0], (Cout, Cin, 3)),
        conv1_b=nrm(ks[1], (Cout,)),
        bn1_gamma=1.0 + nrm(ks[2], (Cout,)),
        bn1_beta=nrm(ks[3], (Cout,)),
        bn1_mean=nrm(ks[4], (Cout,)),
        bn1_var=0.5 + jax.random.uniform(ks[5], (Cout,), jnp.float32),
        conv2_w=nrm(ks[6], (Cout, Cout, 3)),
        conv2_b=nrm(ks[7], (Cout,)),
        bn2_gamma=1.0 + nrm(ks[8], (Cout,)),
        bn2_beta=nrm(ks[9], (Cout,)),
        bn2_mean=nrm(ks[10], (Cout,)),
        bn2_var=0.5 + jax.random.uniform(ks[11], (Cout,), jnp.float32),
        wk=nrm(ks[12], (Cout, CD)),
        bk=nrm(ks[13], (Cout,)),
        wv=nrm(ks[14], (Cout, CD)),
        bv=nrm(ks[15], (Cout,)),
        in_proj_w=nrm(ks[16], (3 * Cout, Cout)),
        in_proj_b=nrm(ks[17], (3 * Cout,)),
        out_proj_w=nrm(ks[18], (Cout, Cout)),
        out_proj_b=nrm(ks[19], (Cout,)),
    )

    x = jax.random.normal(ks[20], (B, Cin, L), jnp.float32)
    cond = jax.random.normal(ks[21], (B, N, CD), jnp.float32)

    out = encoder_block_1d(x, cond, params, num_heads=H)
    out = jax.block_until_ready(out)

    ref = reference_forward(x, cond, params, num_heads=H)
    assert out.shape == (B, Cout, L // 2), out.shape
    # bf16 MXU operands + approximate softmax reciprocal -> loosened tolerance.
    err = float(jnp.max(jnp.abs(out - ref)))
    assert err < 5e-2, err

    print("KERNEL_OK")
</pallas_src>

<mosaic_0001>
module attributes {stable_mosaic.version = 11 : i64} {
  func.func @_encoder_block_kernel(%arg0: i32, %arg1: memref<16x8xbf16, #tpu.memory_space<vmem>>, %arg2: memref<16x16xbf16, #tpu.memory_space<vmem>>, %arg3: memref<12x32xbf16, #tpu.memory_space<vmem>>, %arg4: memref<96x32xbf16, #tpu.memory_space<vmem>>, %arg5: memref<16x64xbf16, #tpu.memory_space<vmem>>, %arg6: memref<2x32x32xbf16, #tpu.memory_space<vmem>>, %arg7: memref<8x32xf32, #tpu.memory_space<vmem>>, %arg8: memref<16x32xf32, #tpu.memory_space<vmem>>) attributes {dimension_semantics = [#tpu.dimension_semantics<parallel>], iteration_bounds = array<i64: 1>, scalar_prefetch = 0 : i64, scratch_operands = 0 : i64, tpu.core_type = #tpu.core_type<tc>, window_params = [{transform_indices = @transform_0, window_bounds = array<i64: 16, 8>}, {transform_indices = @transform_1, window_bounds = array<i64: 16, 16>}, {pipeline_mode = #tpu.pipeline_mode<synchronous>, transform_indices = @transform_2, window_bounds = array<i64: 12, 32>}, {pipeline_mode = #tpu.pipeline_mode<synchronous>, transform_indices = @transform_3, window_bounds = array<i64: 96, 32>}, {pipeline_mode = #tpu.pipeline_mode<synchronous>, transform_indices = @transform_4, window_bounds = array<i64: 16, 64>}, {pipeline_mode = #tpu.pipeline_mode<synchronous>, transform_indices = @transform_5, window_bounds = array<i64: 2, 32, 32>}, {pipeline_mode = #tpu.pipeline_mode<synchronous>, transform_indices = @transform_6, window_bounds = array<i64: 8, 32>}, {transform_indices = @transform_7, window_bounds = array<i64: 16, 32>}]} {
    %0 = tpu.iota {dimensions = array<i32: 0>} : vector<16x1xi32>
    %c8_i32 = arith.constant 8 : i32
    %c0_i32 = arith.constant 0 : i32
    %1 = arith.cmpi eq, %c8_i32, %c0_i32 : i32
    %c1_i32 = arith.constant 1 : i32
    %2 = arith.select %1, %c1_i32, %c8_i32 : i32
    %3 = vector.broadcast %2 : i32 to vector<16x1xi32>
    %4 = arith.remsi %0, %3 : vector<16x1xi32>
    %c0_i32_0 = arith.constant 0 : i32
    %5 = vector.broadcast %c0_i32_0 : i32 to vector<16x1xi32>
    %6 = arith.cmpi ne, %4, %5 : vector<16x1xi32>
    %c0_i32_1 = arith.constant 0 : i32
    %7 = vector.broadcast %c0_i32_1 : i32 to vector<16x1xi32>
    %8 = arith.cmpi slt, %4, %7 : vector<16x1xi32>
    %c0_i32_2 = arith.constant 0 : i32
    %9 = arith.cmpi slt, %2, %c0_i32_2 : i32
    %10 = vector.broadcast %9 : i1 to vector<16x1xi1>
    %11 = vector.broadcast %10 : vector<16x1xi1> to vector<16x1xi1>
    %12 = arith.xori %8, %11 : vector<16x1xi1>
    %13 = arith.andi %12, %6 : vector<16x1xi1>
    %14 = vector.broadcast %2 : i32 to vector<16x1xi32>
    %15 = arith.addi %4, %14 : vector<16x1xi32>
    %16 = arith.select %13, %15, %4 : vector<16x1xi1>, vector<16x1xi32>
    %c0_i32_3 = arith.constant 0 : i32
    %17 = vector.broadcast %c0_i32_3 : i32 to vector<16x1xi32>
    %18 = arith.cmpi ne, %16, %17 : vector<16x1xi32>
    %c7_i32 = arith.constant 7 : i32
    %19 = vector.broadcast %c7_i32 : i32 to vector<16x1xi32>
    %20 = arith.cmpi ne, %16, %19 : vector<16x1xi32>
    %c0 = arith.constant 0 : index
    %c0_4 = arith.constant 0 : index
    %21 = vector.load %arg1[%c0, %c0_4] : memref<16x8xbf16, #tpu.memory_space<vmem>>, vector<16x8xbf16>
    %22 = vector.extract_strided_slice %21 {offsets = [0, 0], sizes = [16, 4], strides = [1, 1]} : vector<16x8xbf16> to vector<16x4xbf16>
    %23 = vector.extract_strided_slice %21 {offsets = [0, 4], sizes = [16, 4], strides = [1, 1]} : vector<16x8xbf16> to vector<16x4xbf16>
    %24 = arith.maximumf %22, %23 : vector<16x4xbf16>
    %25 = arith.extf %24 : vector<16x4xbf16> to vector<16x4xf32>
    %c0_5 = arith.constant 0 : index
    %c0_6 = arith.constant 0 : index
    %26 = vector.load %arg7[%c0_5, %c0_6] : memref<8x32xf32, #tpu.memory_space<vmem>>, vector<1x32xf32>
    %c1 = arith.constant 1 : index
    %c0_7 = arith.constant 0 : index
    %27 = vector.load %arg7[%c1, %c0_7] : memref<8x32xf32, #tpu.memory_space<vmem>>, vector<1x32xf32>
    %c1_i32_8 = arith.constant 1 : i32
    %28 = tpu.dynamic_rotate %25 by %c1_i32_8 dim 0 : vector<16x4xf32>, i32 -> vector<16x4xf32>
    %cst = arith.constant 0.000000e+00 : f32
    %29 = vector.shape_cast %18 : vector<16x1xi1> to vector<16x1xi1>
    %30 = vector.broadcast %29 : vector<16x1xi1> to vector<16x4xi1>
    %31 = vector.broadcast %cst : f32 to vector<16x4xf32>
    %32 = arith.select %30, %28, %31 : vector<16x4xi1>, vector<16x4xf32>
    %c15_i32 = arith.constant 15 : i32
    %33 = tpu.dynamic_rotate %25 by %c15_i32 dim 0 : vector<16x4xf32>, i32 -> vector<16x4xf32>
    %cst_9 = arith.constant 0.000000e+00 : f32
    %34 = vector.shape_cast %20 : vector<16x1xi1> to vector<16x1xi1>
    %35 = vector.broadcast %34 : vector<16x1xi1> to vector<16x4xi1>
    %36 = vector.broadcast %cst_9 : f32 to vector<16x4xf32>
    %37 = arith.select %35, %33, %36 : vector<16x4xi1>, vector<16x4xf32>
    %38 = tpu.concatenate %32, %25, %37 in 1 : vector<16x4xf32>, vector<16x4xf32>, vector<16x4xf32> -> vector<16x12xf32>
    %39 = arith.truncf %38 : vector<16x12xf32> to vector<16x12xbf16>
    %c0_10 = arith.constant 0 : index
    %c0_11 = arith.constant 0 : index
    %40 = vector.load %arg3[%c0_10, %c0_11] : memref<12x32xbf16, #tpu.memory_space<vmem>>, vector<12x32xbf16>
    %cst_12 = arith.constant dense<0.000000e+00> : vector<16x32xf32>
    %41 = tpu.matmul %39, %40, %cst_12 {dimension_numbers = #tpu.dot_dimension_numbers<[1], [0], [0], [1], [0, 0, 1, 1], [], []>} : vector<16x12xbf16>, vector<12x32xbf16>, vector<16x32xf32> -> vector<16x32xf32>
    %42 = vector.broadcast %26 : vector<1x32xf32> to vector<16x32xf32>
    %43 = arith.mulf %41, %42 : vector<16x32xf32>
    %44 = vector.broadcast %27 : vector<1x32xf32> to vector<16x32xf32>
    %45 = arith.addf %43, %44 : vector<16x32xf32>
    %cst_13 = arith.constant 0.000000e+00 : f32
    %46 = vector.broadcast %cst_13 : f32 to vector<16x32xf32>
    %47 = arith.maximumf %45, %46 : vector<16x32xf32>
    %c2 = arith.constant 2 : index
    %c0_14 = arith.constant 0 : index
    %48 = vector.load %arg7[%c2, %c0_14] : memref<8x32xf32, #tpu.memory_space<vmem>>, vector<1x32xf32>
    %c3 = arith.constant 3 : index
    %c0_15 = arith.constant 0 : index
    %49 = vector.load %arg7[%c3, %c0_15] : memref<8x32xf32, #tpu.memory_space<vmem>>, vector<1x32xf32>
    %c1_i32_16 = arith.constant 1 : i32
    %50 = tpu.dynamic_rotate %47 by %c1_i32_16 dim 0 : vector<16x32xf32>, i32 -> vector<16x32xf32>
    %cst_17 = arith.constant 0.000000e+00 : f32
    %51 = vector.shape_cast %18 : vector<16x1xi1> to vector<16x1xi1>
    %52 = vector.broadcast %51 : vector<16x1xi1> to vector<16x32xi1>
    %53 = vector.broadcast %cst_17 : f32 to vector<16x32xf32>
    %54 = arith.select %52, %50, %53 : vector<16x32xi1>, vector<16x32xf32>
    %c15_i32_18 = arith.constant 15 : i32
    %55 = tpu.dynamic_rotate %47 by %c15_i32_18 dim 0 : vector<16x32xf32>, i32 -> vector<16x32xf32>
    %cst_19 = arith.constant 0.000000e+00 : f32
    %56 = vector.shape_cast %20 : vector<16x1xi1> to vector<16x1xi1>
    %57 = vector.broadcast %56 : vector<16x1xi1> to vector<16x32xi1>
    %58 = vector.broadcast %cst_19 : f32 to vector<16x32xf32>
    %59 = arith.select %57, %55, %58 : vector<16x32xi1>, vector<16x32xf32>
    %60 = tpu.concatenate %54, %47, %59 in 1 : vector<16x32xf32>, vector<16x32xf32>, vector<16x32xf32> -> vector<16x96xf32>
    %61 = arith.truncf %60 : vector<16x96xf32> to vector<16x96xbf16>
    %c0_20 = arith.constant 0 : index
    %c0_21 = arith.constant 0 : index
    %62 = vector.load %arg4[%c0_20, %c0_21] : memref<96x32xbf16, #tpu.memory_space<vmem>>, vector<96x32xbf16>
    %cst_22 = arith.constant dense<0.000000e+00> : vector<16x32xf32>
    %63 = tpu.matmul %61, %62, %cst_22 {dimension_numbers = #tpu.dot_dimension_numbers<[1], [0], [0], [1], [0, 0, 1, 1], [], []>} : vector<16x96xbf16>, vector<96x32xbf16>, vector<16x32xf32> -> vector<16x32xf32>
    %64 = vector.broadcast %48 : vector<1x32xf32> to vector<16x32xf32>
    %65 = arith.mulf %63, %64 : vector<16x32xf32>
    %66 = vector.broadcast %49 : vector<1x32xf32> to vector<16x32xf32>
    %67 = arith.addf %65, %66 : vector<16x32xf32>
    %cst_23 = arith.constant 0.000000e+00 : f32
    %68 = vector.broadcast %cst_23 : f32 to vector<16x32xf32>
    %69 = arith.maximumf %67, %68 : vector<16x32xf32>
    %c0_24 = arith.constant 0 : index
    %c0_25 = arith.constant 0 : index
    %70 = vector.load %arg2[%c0_24, %c0_25] : memref<16x16xbf16, #tpu.memory_space<vmem>>, vector<16x16xbf16>
    %c0_26 = arith.constant 0 : index
    %c0_27 = arith.constant 0 : index
    %71 = vector.load %arg5[%c0_26, %c0_27] : memref<16x64xbf16, #tpu.memory_space<vmem>>, vector<16x64xbf16>
    %cst_28 = arith.constant dense<0.000000e+00> : vector<16x64xf32>
    %72 = tpu.matmul %70, %71, %cst_28 {dimension_numbers = #tpu.dot_dimension_numbers<[1], [0], [0], [1], [0, 0, 1, 1], [], []>} : vector<16x16xbf16>, vector<16x64xbf16>, vector<16x64xf32> -> vector<16x64xf32>
    %73 = vector.extract_strided_slice %72 {offsets = [0, 0], sizes = [16, 32], strides = [1, 1]} : vector<16x64xf32> to vector<16x32xf32>
    %c6 = arith.constant 6 : index
    %c0_29 = arith.constant 0 : index
    %74 = vector.load %arg7[%c6, %c0_29] : memref<8x32xf32, #tpu.memory_space<vmem>>, vector<1x32xf32>
    %75 = vector.broadcast %74 : vector<1x32xf32> to vector<16x32xf32>
    %76 = arith.addf %73, %75 : vector<16x32xf32>
    %77 = arith.truncf %76 : vector<16x32xf32> to vector<16x32xbf16>
    %78 = vector.extract_strided_slice %72 {offsets = [0, 32], sizes = [16, 32], strides = [1, 1]} : vector<16x64xf32> to vector<16x32xf32>
    %c7 = arith.constant 7 : index
    %c0_30 = arith.constant 0 : index
    %79 = vector.load %arg7[%c7, %c0_30] : memref<8x32xf32, #tpu.memory_space<vmem>>, vector<1x32xf32>
    %80 = vector.broadcast %79 : vector<1x32xf32> to vector<16x32xf32>
    %81 = arith.addf %78, %80 : vector<16x32xf32>
    %82 = arith.truncf %81 : vector<16x32xf32> to vector<16x32xbf16>
    %c0_31 = arith.constant 0 : index
    %c0_32 = arith.constant 0 : index
    %c0_33 = arith.constant 0 : index
    %83 = vector.load %arg6[%c0_31, %c0_32, %c0_33] : memref<2x32x32xbf16, #tpu.memory_space<vmem>>, vector<1x32x32xbf16>
    %84 = vector.shape_cast %83 : vector<1x32x32xbf16> to vector<32x32xbf16>
    %85 = arith.truncf %69 : vector<16x32xf32> to vector<16x32xbf16>
    %cst_34 = arith.constant dense<0.000000e+00> : vector<16x32xf32>
    %86 = tpu.matmul %85, %84, %cst_34 {dimension_numbers = #tpu.dot_dimension_numbers<[1], [0], [0], [1], [0, 0, 1, 1], [], []>} : vector<16x32xbf16>, vector<32x32xbf16>, vector<16x32xf32> -> vector<16x32xf32>
    %c4 = arith.constant 4 : index
    %c0_35 = arith.constant 0 : index
    %87 = vector.load %arg7[%c4, %c0_35] : memref<8x32xf32, #tpu.memory_space<vmem>>, vector<1x32xf32>
    %88 = vector.broadcast %87 : vector<1x32xf32> to vector<16x32xf32>
    %89 = arith.addf %86, %88 : vector<16x32xf32>
    %90 = arith.truncf %89 : vector<16x32xf32> to vector<16x32xbf16>
    %91 = vector.extract_strided_slice %90 {offsets = [0, 0], sizes = [16, 8], strides = [1, 1]} : vector<16x32xbf16> to vector<16x8xbf16>
    %92 = vector.shape_cast %91 : vector<16x8xbf16> to vector<2x8x8xbf16>
    %93 = vector.extract_strided_slice %90 {offsets = [0, 8], sizes = [16, 8], strides = [1, 1]} : vector<16x32xbf16> to vector<16x8xbf16>
    %94 = vector.shape_cast %93 : vector<16x8xbf16> to vector<2x8x8xbf16>
    %95 = vector.extract_strided_slice %90 {offsets = [0, 16], sizes = [16, 8], strides = [1, 1]} : vector<16x32xbf16> to vector<16x8xbf16>
    %96 = vector.shape_cast %95 : vector<16x8xbf16> to vector<2x8x8xbf16>
    %97 = vector.extract_strided_slice %90 {offsets = [0, 24], sizes = [16, 8], strides = [1, 1]} : vector<16x32xbf16> to vector<16x8xbf16>
    %98 = vector.shape_cast %97 : vector<16x8xbf16> to vector<2x8x8xbf16>
    %99 = tpu.concatenate %92, %94, %96, %98 in 0 : vector<2x8x8xbf16>, vector<2x8x8xbf16>, vector<2x8x8xbf16>, vector<2x8x8xbf16> -> vector<8x8x8xbf16>
    %100 = vector.extract_strided_slice %77 {offsets = [0, 0], sizes = [16, 8], strides = [1, 1]} : vector<16x32xbf16> to vector<16x8xbf16>
    %101 = vector.shape_cast %100 : vector<16x8xbf16> to vector<2x8x8xbf16>
    %102 = vector.extract_strided_slice %77 {offsets = [0, 8], sizes = [16, 8], strides = [1, 1]} : vector<16x32xbf16> to vector<16x8xbf16>
    %103 = vector.shape_cast %102 : vector<16x8xbf16> to vector<2x8x8xbf16>
    %104 = vector.extract_strided_slice %77 {offsets = [0, 16], sizes = [16, 8], strides = [1, 1]} : vector<16x32xbf16> to vector<16x8xbf16>
    %105 = vector.shape_cast %104 : vector<16x8xbf16> to vector<2x8x8xbf16>
    %106 = vector.extract_strided_slice %77 {offsets = [0, 24], sizes = [16, 8], strides = [1, 1]} : vector<16x32xbf16> to vector<16x8xbf16>
    %107 = vector.shape_cast %106 : vector<16x8xbf16> to vector<2x8x8xbf16>
    %108 = tpu.concatenate %101, %103, %105, %107 in 0 : vector<2x8x8xbf16>, vector<2x8x8xbf16>, vector<2x8x8xbf16>, vector<2x8x8xbf16> -> vector<8x8x8xbf16>
    %109 = vector.extract_strided_slice %82 {offsets = [0, 0], sizes = [16, 8], strides = [1, 1]} : vector<16x32xbf16> to vector<16x8xbf16>
    %110 = vector.shape_cast %109 : vector<16x8xbf16> to vector<2x8x8xbf16>
    %111 = vector.extract_strided_slice %82 {offsets = [0, 8], sizes = [16, 8], strides = [1, 1]} : vector<16x32xbf16> to vector<16x8xbf16>
    %112 = vector.shape_cast %111 : vector<16x8xbf16> to vector<2x8x8xbf16>
    %113 = vector.extract_strided_slice %82 {offsets = [0, 16], sizes = [16, 8], strides = [1, 1]} : vector<16x32xbf16> to vector<16x8xbf16>
    %114 = vector.shape_cast %113 : vector<16x8xbf16> to vector<2x8x8xbf16>
    %115 = vector.extract_strided_slice %82 {offsets = [0, 24], sizes = [16, 8], strides = [1, 1]} : vector<16x32xbf16> to vector<16x8xbf16>
    %116 = vector.shape_cast %115 : vector<16x8xbf16> to vector<2x8x8xbf16>
    %117 = tpu.concatenate %110, %112, %114, %116 in 0 : vector<2x8x8xbf16>, vector<2x8x8xbf16>, vector<2x8x8xbf16>, vector<2x8x8xbf16> -> vector<8x8x8xbf16>
    "tpu.trace_start"() <{level = 10 : i32, message = "bld,bnd->bln"}> : () -> ()
    %cst_36 = arith.constant dense<0.000000e+00> : vector<8x8x8xf32>
    %118 = tpu.matmul %99, %108, %cst_36 {dimension_numbers = #tpu.dot_dimension_numbers<[2], [2], [1], [1], [0, 0, 0, 1, 1, 1], [0], [0]>} : vector<8x8x8xbf16>, vector<8x8x8xbf16>, vector<8x8x8xf32> -> vector<8x8x8xf32>
    "tpu.trace_stop"() : () -> ()
    %cst_37 = arith.constant dense<0xFF800000> : vector<8x8xf32>
    %119 = vector.multi_reduction <maximumf>, %118, %cst_37 [2] : vector<8x8x8xf32> to vector<8x8xf32>
    %120 = vector.shape_cast %119 : vector<8x8xf32> to vector<8x8x1xf32>
    %121 = vector.broadcast %120 : vector<8x8x1xf32> to vector<8x8x8xf32>
    %122 = arith.subf %118, %121 : vector<8x8x8xf32>
    %123 = math.exp %122 : vector<8x8x8xf32>
    %cst_38 = arith.constant dense<0.000000e+00> : vector<8x8xf32>
    %124 = vector.multi_reduction <add>, %123, %cst_38 [2] : vector<8x8x8xf32> to vector<8x8xf32>
    %125 = vector.shape_cast %124 : vector<8x8xf32> to vector<8x8x1xf32>
    %126 = tpu.reciprocal %125 {approx = true} : vector<8x8x1xf32> -> vector<8x8x1xf32>
    %127 = vector.broadcast %126 : vector<8x8x1xf32> to vector<8x8x8xf32>
    %128 = arith.mulf %123, %127 : vector<8x8x8xf32>
    %129 = arith.truncf %128 : vector<8x8x8xf32> to vector<8x8x8xbf16>
    "tpu.trace_start"() <{level = 10 : i32, message = "bln,bnd->bld"}> : () -> ()
    %cst_39 = arith.constant dense<0.000000e+00> : vector<8x8x8xf32>
    %130 = tpu.matmul %129, %117, %cst_39 {dimension_numbers = #tpu.dot_dimension_numbers<[2], [1], [1], [2], [0, 0, 0, 1, 1, 2], [0], [0]>} : vector<8x8x8xbf16>, vector<8x8x8xbf16>, vector<8x8x8xf32> -> vector<8x8x8xf32>
    "tpu.trace_stop"() : () -> ()
    %131 = vector.extract_strided_slice %130 {offsets = [0, 0, 0], sizes = [2, 8, 8], strides = [1, 1, 1]} : vector<8x8x8xf32> to vector<2x8x8xf32>
    %132 = vector.shape_cast %131 : vector<2x8x8xf32> to vector<16x8xf32>
    %133 = vector.extract_strided_slice %130 {offsets = [2, 0, 0], sizes = [2, 8, 8], strides = [1, 1, 1]} : vector<8x8x8xf32> to vector<2x8x8xf32>
    %134 = vector.shape_cast %133 : vector<2x8x8xf32> to vector<16x8xf32>
    %135 = vector.extract_strided_slice %130 {offsets = [4, 0, 0], sizes = [2, 8, 8], strides = [1, 1, 1]} : vector<8x8x8xf32> to vector<2x8x8xf32>
    %136 = vector.shape_cast %135 : vector<2x8x8xf32> to vector<16x8xf32>
    %137 = vector.extract_strided_slice %130 {offsets = [6, 0, 0], sizes = [2, 8, 8], strides = [1, 1, 1]} : vector<8x8x8xf32> to vector<2x8x8xf32>
    %138 = vector.shape_cast %137 : vector<2x8x8xf32> to vector<16x8xf32>
    %139 = tpu.concatenate %132, %134, %136, %138 in 1 : vector<16x8xf32>, vector<16x8xf32>, vector<16x8xf32>, vector<16x8xf32> -> vector<16x32xf32>
    %c1_40 = arith.constant 1 : index
    %c0_41 = arith.constant 0 : index
    %c0_42 = arith.constant 0 : index
    %140 = vector.load %arg6[%c1_40, %c0_41, %c0_42] : memref<2x32x32xbf16, #tpu.memory_space<vmem>>, vector<1x32x32xbf16>
    %141 = vector.shape_cast %140 : vector<1x32x32xbf16> to vector<32x32xbf16>
    %142 = arith.truncf %139 : vector<16x32xf32> to vector<16x32xbf16>
    %cst_43 = arith.constant dense<0.000000e+00> : vector<16x32xf32>
    %143 = tpu.matmul %142, %141, %cst_43 {dimension_numbers = #tpu.dot_dimension_numbers<[1], [0], [0], [1], [0, 0, 1, 1], [], []>} : vector<16x32xbf16>, vector<32x32xbf16>, vector<16x32xf32> -> vector<16x32xf32>
    %c5 = arith.constant 5 : index
    %c0_44 = arith.constant 0 : index
    %144 = vector.load %arg7[%c5, %c0_44] : memref<8x32xf32, #tpu.memory_space<vmem>>, vector<1x32xf32>
    %145 = vector.broadcast %144 : vector<1x32xf32> to vector<16x32xf32>
    %146 = arith.addf %143, %145 : vector<16x32xf32>
    %147 = arith.addf %69, %146 : vector<16x32xf32>
    %c0_45 = arith.constant 0 : index
    %c0_46 = arith.constant 0 : index
    %148 = vector.load %arg8[%c0_45, %c0_46] : memref<16x32xf32, #tpu.memory_space<vmem>>, vector<16x32xf32>
    tpu.vector_store %arg8[%c0_45, %c0_46], %147 {strides = array<i32>} : memref<16x32xf32, #tpu.memory_space<vmem>>, vector<16x32xf32>,
    return
  }
  func.func @transform_0(%arg0: i32) -> (i32, i32) {
    %c0_i32 = arith.constant 0 : i32
    %c0_i32_0 = arith.constant 0 : i32
    return %arg0, %c0_i32 : i32, i32
  }
  func.func @transform_1(%arg0: i32) -> (i32, i32) {
    %c0_i32 = arith.constant 0 : i32
    %c0_i32_0 = arith.constant 0 : i32
    return %arg0, %c0_i32 : i32, i32
  }
  func.func @transform_2(%arg0: i32) -> (i32, i32) {
    %c0_i32 = arith.constant 0 : i32
    %c0_i32_0 = arith.constant 0 : i32
    %c0_i32_1 = arith.constant 0 : i32
    return %c0_i32, %c0_i32_0 : i32, i32
  }
  func.func @transform_3(%arg0: i32) -> (i32, i32) {
    %c0_i32 = arith.constant 0 : i32
    %c0_i32_0 = arith.constant 0 : i32
    %c0_i32_1 = arith.constant 0 : i32
    return %c0_i32, %c0_i32_0 : i32, i32
  }
  func.func @transform_4(%arg0: i32) -> (i32, i32) {
    %c0_i32 = arith.constant 0 : i32
    %c0_i32_0 = arith.constant 0 : i32
    %c0_i32_1 = arith.constant 0 : i32
    return %c0_i32, %c0_i32_0 : i32, i32
  }
  func.func @transform_5(%arg0: i32) -> (i32, i32, i32) {
    %c0_i32 = arith.constant 0 : i32
    %c0_i32_0 = arith.constant 0 : i32
    %c0_i32_1 = arith.constant 0 : i32
    %c0_i32_2 = arith.constant 0 : i32
    return %c0_i32, %c0_i32_0, %c0_i32_1 : i32, i32, i32
  }
  func.func @transform_6(%arg0: i32) -> (i32, i32) {
    %c0_i32 = arith.constant 0 : i32
    %c0_i32_0 = arith.constant 0 : i32
    %c0_i32_1 = arith.constant 0 : i32
    return %c0_i32, %c0_i32_0 : i32, i32
  }
  func.func @transform_7(%arg0: i32) -> (i32, i32) {
    %c0_i32 = arith.constant 0 : i32
    %c0_i32_0 = arith.constant 0 : i32
    return %arg0, %c0_i32 : i32, i32
  }
}

module attributes {stable_mosaic.version = 11 : i64} {
  func.func @_encoder_block_kernel(%arg0: i32, %arg1: memref<16x8xbf16, #tpu.memory_space<vmem>>, %arg2: memref<16x16xbf16, #tpu.memory_space<vmem>>, %arg3: memref<12x32xbf16, #tpu.memory_space<vmem>>, %arg4: memref<96x32xbf16, #tpu.memory_space<vmem>>, %arg5: memref<16x64xbf16, #tpu.memory_space<vmem>>, %arg6: memref<2x32x32xbf16, #tpu.memory_space<vmem>>, %arg7: memref<8x32xf32, #tpu.memory_space<vmem>>, %arg8: memref<16x32xf32, #tpu.memory_space<vmem>>) attributes {dimension_semantics = [#tpu.dimension_semantics<parallel>], iteration_bounds = array<i64: 1>, scalar_prefetch = 0 : i64, scratch_operands = 0 : i64, tpu.core_type = #tpu.core_type<tc>, window_params = [{transform_indices = @transform_0, window_bounds = array<i64: 16, 8>}, {transform_indices = @transform_1, window_bounds = array<i64: 16, 16>}, {pipeline_mode = #tpu.pipeline_mode<synchronous>, transform_indices = @transform_2, window_bounds = array<i64: 12, 32>}, {pipeline_mode = #tpu.pipeline_mode<synchronous>, transform_indices = @transform_3, window_bounds = array<i64: 96, 32>}, {pipeline_mode = #tpu.pipeline_mode<synchronous>, transform_indices = @transform_4, window_bounds = array<i64: 16, 64>}, {pipeline_mode = #tpu.pipeline_mode<synchronous>, transform_indices = @transform_5, window_bounds = array<i64: 2, 32, 32>}, {pipeline_mode = #tpu.pipeline_mode<synchronous>, transform_indices = @transform_6, window_bounds = array<i64: 8, 32>}, {transform_indices = @transform_7, window_bounds = array<i64: 16, 32>}]} {
    %0 = tpu.iota {dimensions = array<i32: 0>} : vector<16x1xi32>
    %c8_i32 = arith.constant 8 : i32
    %c0_i32 = arith.constant 0 : i32
    %1 = arith.cmpi eq, %c8_i32, %c0_i32 : i32
    %c1_i32 = arith.constant 1 : i32
    %2 = arith.select %1, %c1_i32, %c8_i32 : i32
    %3 = vector.broadcast %2 : i32 to vector<16x1xi32>
    %4 = arith.remsi %0, %3 : vector<16x1xi32>
    %c0_i32_0 = arith.constant 0 : i32
    %5 = vector.broadcast %c0_i32_0 : i32 to vector<16x1xi32>
    %6 = arith.cmpi ne, %4, %5 : vector<16x1xi32>
    %c0_i32_1 = arith.constant 0 : i32
    %7 = vector.broadcast %c0_i32_1 : i32 to vector<16x1xi32>
    %8 = arith.cmpi slt, %4, %7 : vector<16x1xi32>
    %c0_i32_2 = arith.constant 0 : i32
    %9 = arith.cmpi slt, %2, %c0_i32_2 : i32
    %10 = vector.broadcast %9 : i1 to vector<16x1xi1>
    %11 = vector.broadcast %10 : vector<16x1xi1> to vector<16x1xi1>
    %12 = arith.xori %8, %11 : vector<16x1xi1>
    %13 = arith.andi %12, %6 : vector<16x1xi1>
    %14 = vector.broadcast %2 : i32 to vector<16x1xi32>
    %15 = arith.addi %4, %14 : vector<16x1xi32>
    %16 = arith.select %13, %15, %4 : vector<16x1xi1>, vector<16x1xi32>
    %c0_i32_3 = arith.constant 0 : i32
    %17 = vector.broadcast %c0_i32_3 : i32 to vector<16x1xi32>
    %18 = arith.cmpi ne, %16, %17 : vector<16x1xi32>
    %c7_i32 = arith.constant 7 : i32
    %19 = vector.broadcast %c7_i32 : i32 to vector<16x1xi32>
    %20 = arith.cmpi ne, %16, %19 : vector<16x1xi32>
    %c0 = arith.constant 0 : index
    %c0_4 = arith.constant 0 : index
    %21 = vector.load %arg1[%c0, %c0_4] : memref<16x8xbf16, #tpu.memory_space<vmem>>, vector<16x8xbf16>
    %22 = vector.extract_strided_slice %21 {offsets = [0, 0], sizes = [16, 4], strides = [1, 1]} : vector<16x8xbf16> to vector<16x4xbf16>
    %23 = vector.extract_strided_slice %21 {offsets = [0, 4], sizes = [16, 4], strides = [1, 1]} : vector<16x8xbf16> to vector<16x4xbf16>
    %24 = arith.maximumf %22, %23 : vector<16x4xbf16>
    %25 = arith.extf %24 : vector<16x4xbf16> to vector<16x4xf32>
    %c0_5 = arith.constant 0 : index
    %c0_6 = arith.constant 0 : index
    %26 = vector.load %arg7[%c0_5, %c0_6] : memref<8x32xf32, #tpu.memory_space<vmem>>, vector<1x32xf32>
    %c1 = arith.constant 1 : index
    %c0_7 = arith.constant 0 : index
    %27 = vector.load %arg7[%c1, %c0_7] : memref<8x32xf32, #tpu.memory_space<vmem>>, vector<1x32xf32>
    %c1_i32_8 = arith.constant 1 : i32
    %28 = tpu.dynamic_rotate %25 by %c1_i32_8 dim 0 : vector<16x4xf32>, i32 -> vector<16x4xf32>
    %cst = arith.constant 0.000000e+00 : f32
    %29 = vector.shape_cast %18 : vector<16x1xi1> to vector<16x1xi1>
    %30 = vector.broadcast %29 : vector<16x1xi1> to vector<16x4xi1>
    %31 = vector.broadcast %cst : f32 to vector<16x4xf32>
    %32 = arith.select %30, %28, %31 : vector<16x4xi1>, vector<16x4xf32>
    %c15_i32 = arith.constant 15 : i32
    %33 = tpu.dynamic_rotate %25 by %c15_i32 dim 0 : vector<16x4xf32>, i32 -> vector<16x4xf32>
    %cst_9 = arith.constant 0.000000e+00 : f32
    %34 = vector.shape_cast %20 : vector<16x1xi1> to vector<16x1xi1>
    %35 = vector.broadcast %34 : vector<16x1xi1> to vector<16x4xi1>
    %36 = vector.broadcast %cst_9 : f32 to vector<16x4xf32>
    %37 = arith.select %35, %33, %36 : vector<16x4xi1>, vector<16x4xf32>
    %38 = tpu.concatenate %32, %25, %37 in 1 : vector<16x4xf32>, vector<16x4xf32>, vector<16x4xf32> -> vector<16x12xf32>
    %39 = arith.truncf %38 : vector<16x12xf32> to vector<16x12xbf16>
    %c0_10 = arith.constant 0 : index
    %c0_11 = arith.constant 0 : index
    %40 = vector.load %arg3[%c0_10, %c0_11] : memref<12x32xbf16, #tpu.memory_space<vmem>>, vector<12x32xbf16>
    %cst_12 = arith.constant dense<0.000000e+00> : vector<16x32xf32>
    %41 = tpu.matmul %39, %40, %cst_12 {dimension_numbers = #tpu.dot_dimension_numbers<[1], [0], [0], [1], [0, 0, 1, 1], [], []>} : vector<16x12xbf16>, vector<12x32xbf16>, vector<16x32xf32> -> vector<16x32xf32>
    %42 = vector.broadcast %26 : vector<1x32xf32> to vector<16x32xf32>
    %43 = arith.mulf %41, %42 : vector<16x32xf32>
    %44 = vector.broadcast %27 : vector<1x32xf32> to vector<16x32xf32>
    %45 = arith.addf %43, %44 : vector<16x32xf32>
    %cst_13 = arith.constant 0.000000e+00 : f32
    %46 = vector.broadcast %cst_13 : f32 to vector<16x32xf32>
    %47 = arith.maximumf %45, %46 : vector<16x32xf32>
    %c2 = arith.constant 2 : index
    %c0_14 = arith.constant 0 : index
    %48 = vector.load %arg7[%c2, %c0_14] : memref<8x32xf32, #tpu.memory_space<vmem>>, vector<1x32xf32>
    %c3 = arith.constant 3 : index
    %c0_15 = arith.constant 0 : index
    %49 = vector.load %arg7[%c3, %c0_15] : memref<8x32xf32, #tpu.memory_space<vmem>>, vector<1x32xf32>
    %c1_i32_16 = arith.constant 1 : i32
    %50 = tpu.dynamic_rotate %47 by %c1_i32_16 dim 0 : vector<16x32xf32>, i32 -> vector<16x32xf32>
    %cst_17 = arith.constant 0.000000e+00 : f32
    %51 = vector.shape_cast %18 : vector<16x1xi1> to vector<16x1xi1>
    %52 = vector.broadcast %51 : vector<16x1xi1> to vector<16x32xi1>
    %53 = vector.broadcast %cst_17 : f32 to vector<16x32xf32>
    %54 = arith.select %52, %50, %53 : vector<16x32xi1>, vector<16x32xf32>
    %c15_i32_18 = arith.constant 15 : i32
    %55 = tpu.dynamic_rotate %47 by %c15_i32_18 dim 0 : vector<16x32xf32>, i32 -> vector<16x32xf32>
    %cst_19 = arith.constant 0.000000e+00 : f32
    %56 = vector.shape_cast %20 : vector<16x1xi1> to vector<16x1xi1>
    %57 = vector.broadcast %56 : vector<16x1xi1> to vector<16x32xi1>
    %58 = vector.broadcast %cst_19 : f32 to vector<16x32xf32>
    %59 = arith.select %57, %55, %58 : vector<16x32xi1>, vector<16x32xf32>
    %60 = tpu.concatenate %54, %47, %59 in 1 : vector<16x32xf32>, vector<16x32xf32>, vector<16x32xf32> -> vector<16x96xf32>
    %61 = arith.truncf %60 : vector<16x96xf32> to vector<16x96xbf16>
    %c0_20 = arith.constant 0 : index
    %c0_21 = arith.constant 0 : index
    %62 = vector.load %arg4[%c0_20, %c0_21] : memref<96x32xbf16, #tpu.memory_space<vmem>>, vector<96x32xbf16>
    %cst_22 = arith.constant dense<0.000000e+00> : vector<16x32xf32>
    %63 = tpu.matmul %61, %62, %cst_22 {dimension_numbers = #tpu.dot_dimension_numbers<[1], [0], [0], [1], [0, 0, 1, 1], [], []>} : vector<16x96xbf16>, vector<96x32xbf16>, vector<16x32xf32> -> vector<16x32xf32>
    %64 = vector.broadcast %48 : vector<1x32xf32> to vector<16x32xf32>
    %65 = arith.mulf %63, %64 : vector<16x32xf32>
    %66 = vector.broadcast %49 : vector<1x32xf32> to vector<16x32xf32>
    %67 = arith.addf %65, %66 : vector<16x32xf32>
    %cst_23 = arith.constant 0.000000e+00 : f32
    %68 = vector.broadcast %cst_23 : f32 to vector<16x32xf32>
    %69 = arith.maximumf %67, %68 : vector<16x32xf32>
    %c0_24 = arith.constant 0 : index
    %c0_25 = arith.constant 0 : index
    %70 = vector.load %arg2[%c0_24, %c0_25] : memref<16x16xbf16, #tpu.memory_space<vmem>>, vector<16x16xbf16>
    %c0_26 = arith.constant 0 : index
    %c0_27 = arith.constant 0 : index
    %71 = vector.load %arg5[%c0_26, %c0_27] : memref<16x64xbf16, #tpu.memory_space<vmem>>, vector<16x64xbf16>
    %cst_28 = arith.constant dense<0.000000e+00> : vector<16x64xf32>
    %72 = tpu.matmul %70, %71, %cst_28 {dimension_numbers = #tpu.dot_dimension_numbers<[1], [0], [0], [1], [0, 0, 1, 1], [], []>} : vector<16x16xbf16>, vector<16x64xbf16>, vector<16x64xf32> -> vector<16x64xf32>
    %73 = vector.extract_strided_slice %72 {offsets = [0, 0], sizes = [16, 32], strides = [1, 1]} : vector<16x64xf32> to vector<16x32xf32>
    %c6 = arith.constant 6 : index
    %c0_29 = arith.constant 0 : index
    %74 = vector.load %arg7[%c6, %c0_29] : memref<8x32xf32, #tpu.memory_space<vmem>>, vector<1x32xf32>
    %75 = vector.broadcast %74 : vector<1x32xf32> to vector<16x32xf32>
    %76 = arith.addf %73, %75 : vector<16x32xf32>
    %77 = arith.truncf %76 : vector<16x32xf32> to vector<16x32xbf16>
    %78 = vector.extract_strided_slice %72 {offsets = [0, 32], sizes = [16, 32], strides = [1, 1]} : vector<16x64xf32> to vector<16x32xf32>
    %c7 = arith.constant 7 : index
    %c0_30 = arith.constant 0 : index
    %79 = vector.load %arg7[%c7, %c0_30] : memref<8x32xf32, #tpu.memory_space<vmem>>, vector<1x32xf32>
    %80 = vector.broadcast %79 : vector<1x32xf32> to vector<16x32xf32>
    %81 = arith.addf %78, %80 : vector<16x32xf32>
    %82 = arith.truncf %81 : vector<16x32xf32> to vector<16x32xbf16>
    %c0_31 = arith.constant 0 : index
    %c0_32 = arith.constant 0 : index
    %c0_33 = arith.constant 0 : index
    %83 = vector.load %arg6[%c0_31, %c0_32, %c0_33] : memref<2x32x32xbf16, #tpu.memory_space<vmem>>, vector<1x32x32xbf16>
    %84 = vector.shape_cast %83 : vector<1x32x32xbf16> to vector<32x32xbf16>
    %85 = arith.truncf %69 : vector<16x32xf32> to vector<16x32xbf16>
    %cst_34 = arith.constant dense<0.000000e+00> : vector<16x32xf32>
    %86 = tpu.matmul %85, %84, %cst_34 {dimension_numbers = #tpu.dot_dimension_numbers<[1], [0], [0], [1], [0, 0, 1, 1], [], []>} : vector<16x32xbf16>, vector<32x32xbf16>, vector<16x32xf32> -> vector<16x32xf32>
    %c4 = arith.constant 4 : index
    %c0_35 = arith.constant 0 : index
    %87 = vector.load %arg7[%c4, %c0_35] : memref<8x32xf32, #tpu.memory_space<vmem>>, vector<1x32xf32>
    %88 = vector.broadcast %87 : vector<1x32xf32> to vector<16x32xf32>
    %89 = arith.addf %86, %88 : vector<16x32xf32>
    %90 = arith.truncf %89 : vector<16x32xf32> to vector<16x32xbf16>
    %91 = vector.extract_strided_slice %90 {offsets = [0, 0], sizes = [16, 8], strides = [1, 1]} : vector<16x32xbf16> to vector<16x8xbf16>
    %92 = vector.shape_cast %91 : vector<16x8xbf16> to vector<2x8x8xbf16>
    %93 = vector.extract_strided_slice %90 {offsets = [0, 8], sizes = [16, 8], strides = [1, 1]} : vector<16x32xbf16> to vector<16x8xbf16>
    %94 = vector.shape_cast %93 : vector<16x8xbf16> to vector<2x8x8xbf16>
    %95 = vector.extract_strided_slice %90 {offsets = [0, 16], sizes = [16, 8], strides = [1, 1]} : vector<16x32xbf16> to vector<16x8xbf16>
    %96 = vector.shape_cast %95 : vector<16x8xbf16> to vector<2x8x8xbf16>
    %97 = vector.extract_strided_slice %90 {offsets = [0, 24], sizes = [16, 8], strides = [1, 1]} : vector<16x32xbf16> to vector<16x8xbf16>
    %98 = vector.shape_cast %97 : vector<16x8xbf16> to vector<2x8x8xbf16>
    %99 = tpu.concatenate %92, %94, %96, %98 in 0 : vector<2x8x8xbf16>, vector<2x8x8xbf16>, vector<2x8x8xbf16>, vector<2x8x8xbf16> -> vector<8x8x8xbf16>
    %100 = vector.extract_strided_slice %77 {offsets = [0, 0], sizes = [16, 8], strides = [1, 1]} : vector<16x32xbf16> to vector<16x8xbf16>
    %101 = vector.shape_cast %100 : vector<16x8xbf16> to vector<2x8x8xbf16>
    %102 = vector.extract_strided_slice %77 {offsets = [0, 8], sizes = [16, 8], strides = [1, 1]} : vector<16x32xbf16> to vector<16x8xbf16>
    %103 = vector.shape_cast %102 : vector<16x8xbf16> to vector<2x8x8xbf16>
    %104 = vector.extract_strided_slice %77 {offsets = [0, 16], sizes = [16, 8], strides = [1, 1]} : vector<16x32xbf16> to vector<16x8xbf16>
    %105 = vector.shape_cast %104 : vector<16x8xbf16> to vector<2x8x8xbf16>
    %106 = vector.extract_strided_slice %77 {offsets = [0, 24], sizes = [16, 8], strides = [1, 1]} : vector<16x32xbf16> to vector<16x8xbf16>
    %107 = vector.shape_cast %106 : vector<16x8xbf16> to vector<2x8x8xbf16>
    %108 = tpu.concatenate %101, %103, %105, %107 in 0 : vector<2x8x8xbf16>, vector<2x8x8xbf16>, vector<2x8x8xbf16>, vector<2x8x8xbf16> -> vector<8x8x8xbf16>
    %109 = vector.extract_strided_slice %82 {offsets = [0, 0], sizes = [16, 8], strides = [1, 1]} : vector<16x32xbf16> to vector<16x8xbf16>
    %110 = vector.shape_cast %109 : vector<16x8xbf16> to vector<2x8x8xbf16>
    %111 = vector.extract_strided_slice %82 {offsets = [0, 8], sizes = [16, 8], strides = [1, 1]} : vector<16x32xbf16> to vector<16x8xbf16>
    %112 = vector.shape_cast %111 : vector<16x8xbf16> to vector<2x8x8xbf16>
    %113 = vector.extract_strided_slice %82 {offsets = [0, 16], sizes = [16, 8], strides = [1, 1]} : vector<16x32xbf16> to vector<16x8xbf16>
    %114 = vector.shape_cast %113 : vector<16x8xbf16> to vector<2x8x8xbf16>
    %115 = vector.extract_strided_slice %82 {offsets = [0, 24], sizes = [16, 8], strides = [1, 1]} : vector<16x32xbf16> to vector<16x8xbf16>
    %116 = vector.shape_cast %115 : vector<16x8xbf16> to vector<2x8x8xbf16>
    %117 = tpu.concatenate %110, %112, %114, %116 in 0 : vector<2x8x8xbf16>, vector<2x8x8xbf16>, vector<2x8x8xbf16>, vector<2x8x8xbf16> -> vector<8x8x8xbf16>
    "tpu.trace_start"() <{level = 10 : i32, message = "bld,bnd->bln"}> : () -> ()
    %cst_36 = arith.constant dense<0.000000e+00> : vector<8x8x8xf32>
    %118 = tpu.matmul %99, %108, %cst_36 {dimension_numbers = #tpu.dot_dimension_numbers<[2], [2], [1], [1], [0, 0, 0, 1, 1, 1], [0], [0]>} : vector<8x8x8xbf16>, vector<8x8x8xbf16>, vector<8x8x8xf32> -> vector<8x8x8xf32>
    "tpu.trace_stop"() : () -> ()
    %cst_37 = arith.constant dense<0xFF800000> : vector<8x8xf32>
    %119 = vector.multi_reduction <maximumf>, %118, %cst_37 [2] : vector<8x8x8xf32> to vector<8x8xf32>
    %120 = vector.shape_cast %119 : vector<8x8xf32> to vector<8x8x1xf32>
    %121 = vector.broadcast %120 : vector<8x8x1xf32> to vector<8x8x8xf32>
    %122 = arith.subf %118, %121 : vector<8x8x8xf32>
    %123 = math.exp %122 : vector<8x8x8xf32>
    %cst_38 = arith.constant dense<0.000000e+00> : vector<8x8xf32>
    %124 = vector.multi_reduction <add>, %123, %cst_38 [2] : vector<8x8x8xf32> to vector<8x8xf32>
    %125 = vector.shape_cast %124 : vector<8x8xf32> to vector<8x8x1xf32>
    %126 = tpu.reciprocal %125 {approx = true} : vector<8x8x1xf32> -> vector<8x8x1xf32>
    %127 = vector.broadcast %126 : vector<8x8x1xf32> to vector<8x8x8xf32>
    %128 = arith.mulf %123, %127 : vector<8x8x8xf32>
    %129 = arith.truncf %128 : vector<8x8x8xf32> to vector<8x8x8xbf16>
    "tpu.trace_start"() <{level = 10 : i32, message = "bln,bnd->bld"}> : () -> ()
    %cst_39 = arith.constant dense<0.000000e+00> : vector<8x8x8xf32>
    %130 = tpu.matmul %129, %117, %cst_39 {dimension_numbers = #tpu.dot_dimension_numbers<[2], [1], [1], [2], [0, 0, 0, 1, 1, 2], [0], [0]>} : vector<8x8x8xbf16>, vector<8x8x8xbf16>, vector<8x8x8xf32> -> vector<8x8x8xf32>
    "tpu.trace_stop"() : () -> ()
    %131 = vector.extract_strided_slice %130 {offsets = [0, 0, 0], sizes = [2, 8, 8], strides = [1, 1, 1]} : vector<8x8x8xf32> to vector<2x8x8xf32>
    %132 = vector.shape_cast %131 : vector<2x8x8xf32> to vector<16x8xf32>
    %133 = vector.extract_strided_slice %130 {offsets = [2, 0, 0], sizes = [2, 8, 8], strides = [1, 1, 1]} : vector<8x8x8xf32> to vector<2x8x8xf32>
    %134 = vector.shape_cast %133 : vector<2x8x8xf32> to vector<16x8xf32>
    %135 = vector.extract_strided_slice %130 {offsets = [4, 0, 0], sizes = [2, 8, 8], strides = [1, 1, 1]} : vector<8x8x8xf32> to vector<2x8x8xf32>
    %136 = vector.shape_cast %135 : vector<2x8x8xf32> to vector<16x8xf32>
    %137 = vector.extract_strided_slice %130 {offsets = [6, 0, 0], sizes = [2, 8, 8], strides = [1, 1, 1]} : vector<8x8x8xf32> to vector<2x8x8xf32>
    %138 = vector.shape_cast %137 : vector<2x8x8xf32> to vector<16x8xf32>
    %139 = tpu.concatenate %132, %134, %136, %138 in 1 : vector<16x8xf32>, vector<16x8xf32>, vector<16x8xf32>, vector<16x8xf32> -> vector<16x32xf32>
    %c1_40 = arith.constant 1 : index
    %c0_41 = arith.constant 0 : index
    %c0_42 = arith.constant 0 : index
    %140 = vector.load %arg6[%c1_40, %c0_41, %c0_42] : memref<2x32x32xbf16, #tpu.memory_space<vmem>>, vector<1x32x32xbf16>
    %141 = vector.shape_cast %140 : vector<1x32x32xbf16> to vector<32x32xbf16>
    %142 = arith.truncf %139 : vector<16x32xf32> to vector<16x32xbf16>
    %cst_43 = arith.constant dense<0.000000e+00> : vector<16x32xf32>
    %143 = tpu.matmul %142, %141, %cst_43 {dimension_numbers = #tpu.dot_dimension_numbers<[1], [0], [0], [1], [0, 0, 1, 1], [], []>} : vector<16x32xbf16>, vector<32x32xbf16>, vector<16x32xf32> -> vector<16x32xf32>
    %c5 = arith.constant 5 : index
    %c0_44 = arith.constant 0 : index
    %144 = vector.load %arg7[%c5, %c0_44] : memref<8x32xf32, #tpu.memory_space<vmem>>, vector<1x32xf32>
    %145 = vector.broadcast %144 : vector<1x32xf32> to vector<16x32xf32>
    %146 = arith.addf %143, %145 : vector<16x32xf32>
    %147 = arith.addf %69, %146 : vector<16x32xf32>
    %c0_45 = arith.constant 0 : index
    %c0_46 = arith.constant 0 : index
    %148 = vector.load %arg8[%c0_45, %c0_46] : memref<16x32xf32, #tpu.memory_space<vmem>>, vector<16x32xf32>
    tpu.vector_store %arg8[%c0_45, %c0_46], %147 {strides = array<i32>} : memref<16x32xf32, #tpu.memory_space<vmem>>, vector<16x32xf32>,
    return
  }
  func.func @transform_0(%arg0: i32) -> (i32, i32) {
    %c0_i32 = arith.constant 0 : i32
    %c0_i32_0 = arith.constant 0 : i32
    return %arg0, %c0_i32 : i32, i32
  }
  func.func @transform_1(%arg0: i32) -> (i32, i32) {
    %c0_i32 = arith.constant 0 : i32
    %c0_i32_0 = arith.constant 0 : i32
    return %arg0, %c0_i32 : i32, i32
  }
  func.func @transform_2(%arg0: i32) -> (i32, i32) {
    %c0_i32 = arith.constant 0 : i32
    %c0_i32_0 = arith.constant 0 : i32
    %c0_i32_1 = arith.constant 0 : i32
    return %c0_i32, %c0_i32_0 : i32, i32
  }
  func.func @transform_3(%arg0: i32) -> (i32, i32) {
    %c0_i32 = arith.constant 0 : i32
    %c0_i32_0 = arith.constant 0 : i32
    %c0_i32_1 = arith.constant 0 : i32
    return %c0_i32, %c0_i32_0 : i32, i32
  }
  func.func @transform_4(%arg0: i32) -> (i32, i32) {
    %c0_i32 = arith.constant 0 : i32
    %c0_i32_0 = arith.constant 0 : i32
    %c0_i32_1 = arith.constant 0 : i32
    return %c0_i32, %c0_i32_0 : i32, i32
  }
  func.func @transform_5(%arg0: i32) -> (i32, i32, i32) {
    %c0_i32 = arith.constant 0 : i32
    %c0_i32_0 = arith.constant 0 : i32
    %c0_i32_1 = arith.constant 0 : i32
    %c0_i32_2 = arith.constant 0 : i32
    return %c0_i32, %c0_i32_0, %c0_i32_1 : i32, i32, i32
  }
  func.func @transform_6(%arg0: i32) -> (i32, i32) {
    %c0_i32 = arith.constant 0 : i32
    %c0_i32_0 = arith.constant 0 : i32
    %c0_i32_1 = arith.constant 0 : i32
    return %c0_i32, %c0_i32_0 : i32, i32
  }
  func.func @transform_7(%arg0: i32) -> (i32, i32) {
    %c0_i32 = arith.constant 0 : i32
    %c0_i32_0 = arith.constant 0 : i32
    return %arg0, %c0_i32 : i32, i32
  }
}

</mosaic_0001>

<bundles_post_ra>
// kernel: tpu_custom_call.1
= control target key start
LH: loop header
LB: loop body
LE: loop exit
PB: predicated region body
PF: predicated region fallthrough
CT: control target
= control target key end

     0   :  { %12 = vsyncpa [#allocation3], 0  ;;  %s2638_s0 = inlined_call_operand.hbm [shape: bf16[16,8], index: 0, kind: input, shape index: {}]   ;;  %s2639_s1 = inlined_call_operand.hbm [shape: bf16[16,16], index: 1, kind: input, shape index: {}]   ;;  %s2640_s2 = inlined_call_operand.hbm [shape: bf16[12,32], index: 2, kind: input, shape index: {}]   ;;  %s2641_s3 = inlined_call_operand.hbm [shape: bf16[96,32], index: 3, kind: input, shape index: {}]   ;;  %s2642_s4 = inlined_call_operand.hbm [shape: bf16[16,64], index: 4, kind: input, shape index: {}]   ;;  %s2643_s5 = inlined_call_operand.hbm [shape: bf16[2,32,32], index: 5, kind: input, shape index: {}]   ;;  %s2644_s6 = inlined_call_operand.hbm [shape: f32[8,32], index: 6, kind: input, shape index: {}]   ;;  %s2645_s7 = inlined_call_operand.hbm [shape: f32[16,32], index: 7, kind: output, shape index: {}]  }
   0x1   :  { %13 = vsyncpa [#allocation6], 0 }
   0x2   :  { %14 = vsyncpa [#allocation9], 0 }
   0x3   :  { %15 = vsyncpa [#allocation12], 0 }
   0x4   :  { %16 = vsyncpa [#allocation4], 0  ;;  %s2145_s24 = smov [#allocation5]   ;;  %s2146_s26 = smov [#allocation8]  }
   0x5   :  { %s34_s25 = sshll.u32 %s2145_s24, 4  ;;  %s58_s27 = sshll.u32 %s2146_s26, 4  ;;  %s35_s25 = int_to_ptr.vmem [resolvable:$true] %s34_s25  ;;  %s2207_s27 = int_to_ptr.vmem [resolvable:$true] %s58_s27 }
   0x6   :  { %s1959_s30 = scalar_lea.hbm %s2639_s1, 128 }
   0x7   :  { %p1960_p0 = scmp.ne.s32.totalorder %s2639_s1, %s1959_s30  ;;  %p1963_p1 = scmp.lt.u32.totalorder %s1959_s30, %s2639_s1 }
   0x9   :  { %p1965_p2 = pnand %p1963_p1, %p1960_p0 }
   0xb   :  { %1968 = shalt.err (!%p1965_p2)
}
   0xc   :  { %s1969_s12 = scalar_lea.vmem %s35_s25, 128  ;;  %p1974_p4 = scmp.lt.s32.totalorder %s35_s25, %s35_s25 }
   0xd   :  { %p1970_p3 = scmp.ne.s32.totalorder %s35_s25, %s1969_s12  ;;  %p1975_p5 = scmp.lt.s32.totalorder %s1969_s12, %s1969_s12 }
   0xf   :  { %p1976_p6 = por %p1975_p5, %p1974_p4 }
  0x11   :  { %p1977_p7 = pnand %p1976_p6, %p1970_p3 }
  0x13   :  { %1980 = shalt.err (!%p1977_p7)
}
  0x14   :  { %s2147_s13 = smov 64   ;;  %s2148_s14 = smov 4  }
  0x15   :  { %40 = dma.hbm_to_vmem [thread:$0]  %s2639_s1, 128, %s35_s25, [#allocation6], %s2147_s13, %s2147_s13, %s2148_s14  }
  0x16   :  { %s1981_s19 = scalar_lea.hbm %s2641_s3, 768 }
  0x17   :  { %p1982_p8 = scmp.ne.s32.totalorder %s2641_s3, %s1981_s19  ;;  %p1985_p9 = scmp.lt.u32.totalorder %s1981_s19, %s2641_s3 }
  0x19   :  { %p1987_p10 = pnand %p1985_p9, %p1982_p8 }
  0x1b   :  { %1990 = shalt.err (!%p1987_p10)
}
  0x1c   :  { %s1991_s24 = scalar_lea.vmem %s2207_s27, 768  ;;  %p1996_p12 = scmp.lt.s32.totalorder %s2207_s27, %s2207_s27 }
  0x1d   :  { %p1992_p11 = scmp.ne.s32.totalorder %s2207_s27, %s1991_s24  ;;  %p1997_p13 = scmp.lt.s32.totalorder %s1991_s24, %s1991_s24 }
  0x1f   :  { %p1998_p0 = por %p1997_p13, %p1996_p12 }
  0x21   :  { %p1999_p1 = pnand %p1998_p0, %p1992_p11 }
  0x23   :  { %2002 = shalt.err (!%p1999_p1)
}
  0x24   :  { %64 = dma.hbm_to_vmem [thread:$0]  %s2641_s3, 768, %s2207_s27, [#allocation9], %s2147_s13, %s2147_s13, %s2148_s14  }
  0x25   :  { %s2149_s26 = smov [#allocation11]   ;;  %s2150_s29 = smov [#allocation2]  }
  0x26   :  { %s82_s28 = sshll.u32 %s2149_s26, 4  ;;  %s22_s30 = sshll.u32 %s2150_s29, 4  ;;  %s83_s28 = int_to_ptr.vmem [resolvable:$true] %s82_s28  ;;  %s2244_s30 = int_to_ptr.vmem [resolvable:$true] %s22_s30 }
  0x27   :  { %s2003_s10 = scalar_lea.hbm %s2643_s5, 512 }
  0x28   :  { %p2004_p2 = scmp.ne.s32.totalorder %s2643_s5, %s2003_s10  ;;  %p2007_p3 = scmp.lt.u32.totalorder %s2003_s10, %s2643_s5 }
  0x2a   :  { %p2009_p4 = pnand %p2007_p3, %p2004_p2 }
  0x2c   :  { %2012 = shalt.err (!%p2009_p4)
}
  0x2d   :  { %s2013_s3 = scalar_lea.vmem %s83_s28, 512  ;;  %p2018_p6 = scmp.lt.s32.totalorder %s83_s28, %s83_s28 }
  0x2e   :  { %p2014_p5 = scmp.ne.s32.totalorder %s83_s28, %s2013_s3  ;;  %p2019_p7 = scmp.lt.s32.totalorder %s2013_s3, %s2013_s3 }
  0x30   :  { %p2020_p8 = por %p2019_p7, %p2018_p6 }
  0x32   :  { %p2021_p9 = pnand %p2020_p8, %p2014_p5 }
  0x34   :  { %2024 = shalt.err (!%p2021_p9)
}
  0x35   :  { %88 = dma.hbm_to_vmem [thread:$0]  %s2643_s5, 512, %s83_s28, [#allocation12], %s2147_s13, %s2147_s13, %s2148_s14  }
  0x36   :  { %s2025_s20 = scalar_lea.hbm %s2638_s0, 128 }
  0x37   :  { %p2026_p10 = scmp.ne.s32.totalorder %s2638_s0, %s2025_s20  ;;  %p2029_p11 = scmp.lt.u32.totalorder %s2025_s20, %s2638_s0 }
  0x39   :  { %p2031_p12 = pnand %p2029_p11, %p2026_p10 }
  0x3b   :  { %2034 = shalt.err (!%p2031_p12)
}
  0x3c   :  { %s2035_s1 = scalar_lea.vmem %s2244_s30, 128  ;;  %p2040_p0 = scmp.lt.s32.totalorder %s2244_s30, %s2244_s30 }
  0x3d   :  { %p2036_p13 = scmp.ne.s32.totalorder %s2244_s30, %s2035_s1  ;;  %p2041_p1 = scmp.lt.s32.totalorder %s2035_s1, %s2035_s1 }
  0x3f   :  { %p2042_p2 = por %p2041_p1, %p2040_p0 }
  0x41   :  { %p2043_p3 = pnand %p2042_p2, %p2036_p13 }
  0x43   :  { %2046 = shalt.err (!%p2043_p3)
}
  0x44   :  { %28 = dma.hbm_to_vmem [thread:$0]  %s2638_s0, 128, %s2244_s30, [#allocation3], %s2147_s13, %s2147_s13, %s2148_s14  }
  0x45   :  { %s2151_s26 = smov [#allocation7]   ;;  %s2152_s29 = smov [#allocation10]  }
  0x46   :  { %s46_s28 = sshll.u32 %s2151_s26, 4  ;;  %s70_s8 = sshll.u32 %s2152_s29, 4  ;;  %s47_s28 = int_to_ptr.vmem [resolvable:$true] %s46_s28  ;;  %s2281_s8 = int_to_ptr.vmem [resolvable:$true] %s70_s8 }
  0x47   :  { %s2047_s11 = scalar_lea.hbm %s2640_s2, 128 }
  0x48   :  { %p2048_p4 = scmp.ne.s32.totalorder %s2640_s2, %s2047_s11  ;;  %p2051_p5 = scmp.lt.u32.totalorder %s2047_s11, %s2640_s2 }
  0x4a   :  { %p2053_p6 = pnand %p2051_p5, %p2048_p4 }
  0x4c   :  { %2056 = shalt.err (!%p2053_p6)
}
  0x4d   :  { %s2057_s0 = scalar_lea.vmem %s47_s28, 128  ;;  %p2062_p8 = scmp.lt.s32.totalorder %s47_s28, %s47_s28 }
  0x4e   :  { %p2058_p7 = scmp.ne.s32.totalorder %s47_s28, %s2057_s0  ;;  %p2063_p9 = scmp.lt.s32.totalorder %s2057_s0, %s2057_s0 }
  0x50   :  { %p2064_p10 = por %p2063_p9, %p2062_p8 }
  0x52   :  { %p2065_p11 = pnand %p2064_p10, %p2058_p7 }
  0x54   :  { %2068 = shalt.err (!%p2065_p11)
}
  0x55   :  { %52 = dma.hbm_to_vmem [thread:$0]  %s2640_s2, 128, %s47_s28, [#allocation6], %s2147_s13, %s2147_s13, %s2148_s14  }
  0x56   :  { %s2069_s19 = scalar_lea.hbm %s2642_s4, 128 }
  0x57   :  { %p2070_p12 = scmp.ne.s32.totalorder %s2642_s4, %s2069_s19  ;;  %p2073_p13 = scmp.lt.u32.totalorder %s2069_s19, %s2642_s4 }
  0x59   :  { %p2075_p0 = pnand %p2073_p13, %p2070_p12 }
  0x5b   :  { %2078 = shalt.err (!%p2075_p0)
}
  0x5c   :  { %s2079_s24 = scalar_lea.vmem %s2281_s8, 128  ;;  %p2084_p2 = scmp.lt.s32.totalorder %s2281_s8, %s2281_s8 }
  0x5d   :  { %p2080_p1 = scmp.ne.s32.totalorder %s2281_s8, %s2079_s24  ;;  %p2085_p3 = scmp.lt.s32.totalorder %s2079_s24, %s2079_s24 }
  0x5f   :  { %p2086_p4 = por %p2085_p3, %p2084_p2 }
  0x61   :  { %p2087_p5 = pnand %p2086_p4, %p2080_p1 }
  0x63   :  { %2090 = shalt.err (!%p2087_p5)
}
  0x64   :  { %76 = dma.hbm_to_vmem [thread:$0]  %s2642_s4, 128, %s2281_s8, [#allocation9], %s2147_s13, %s2147_s13, %s2148_s14  }
  0x65   :  { %s2153_s5 = smov [#allocation13]   ;;  %s2091_s29 = scalar_lea.hbm %s2644_s6, 128 }
  0x66   :  { %s95_s25 = sshll.u32 %s2153_s5, 4  ;;  %p2092_p6 = scmp.ne.s32.totalorder %s2644_s6, %s2091_s29  ;;  %s96_s25 = int_to_ptr.vmem [resolvable:$true] %s95_s25 }
  0x67   :  { %p2095_p7 = scmp.lt.u32.totalorder %s2091_s29, %s2644_s6 }
  0x69   :  { %p2097_p8 = pnand %p2095_p7, %p2092_p6 }
  0x6b   :  { %2100 = shalt.err (!%p2097_p8)
}
  0x6c   :  { %s2101_s15 = scalar_lea.vmem %s96_s25, 128  ;;  %p2106_p10 = scmp.lt.s32.totalorder %s96_s25, %s96_s25 }
  0x6d   :  { %p2102_p9 = scmp.ne.s32.totalorder %s96_s25, %s2101_s15  ;;  %p2107_p11 = scmp.lt.s32.totalorder %s2101_s15, %s2101_s15 }
  0x6f   :  { %p2108_p12 = por %p2107_p11, %p2106_p10 }
  0x71   :  { %p2109_p13 = pnand %p2108_p12, %p2102_p9 }
  0x73   :  { %2112 = shalt.err (!%p2109_p13)
}
  0x74   :  { %98 = dma.hbm_to_vmem [thread:$0]  %s2644_s6, 128, %s96_s25, [#allocation12]  }
  0x75   :  { %2135 = dma.done.wait [#allocation3], 128  }
  0x76   :  { %2136 = vsyncadd [#allocation3], 4294967168 }
  0x77   :  { %2137 = dma.done.wait [#allocation6], 256  }
  0x78   :  { %2138 = vsyncadd [#allocation6], 4294967040 }
  0x79   :  { %2139 = dma.done.wait [#allocation9], 896  }
  0x7a   :  { %2140 = vsyncadd [#allocation9], 4294966400 }
  0x7b   :  { %2141 = dma.done.wait [#allocation12], 640  }
  0x7c   :  { %2142 = vsyncadd [#allocation12], 4294966656  ;;  %v152_v0 = vld [vmem:[#allocation2] sm:$0xf]  ;;  %s2154_s16 = smov 124   ;;  %v121_v2 = vlaneseq  ;;  %vm224_vm0 = vcmask 1045504  }
  0x7d   :  { %156 = vrot.lane.b32.xlu0 %v152_v0, %s2154_s16  ;;  %v153_v1 = vld [vmem:[#allocation2 + $0x4] sm:$0xf]  ;;  %v1914_v7 = vld [vmem:[#allocation7] sm:$0x3f]   ;;  %v2155_v8 = vmov 0.0   ;;  %vm2156_vm1 = vmmov 0  }
  0x7e   :  { %v2330_v3 = vshrl.u32 %v121_v2, 7  ;;  %1717 = vmatprep.subr.bf16.mxu0 %v2155_v8  ;;  %v226_v9 = vsel %vm224_vm0, %v1914_v7, 0  ;;  %1723 = vmatprep.subr.bf16.mxu1 %v2155_v8  ;;  %s2157_s6 = smov 8   ;;  %vm206_vm8 = vcmask 31744   ;;  %vm209_vm9 = vcmask 64512   ;;  %v1915_v45 = vld [vmem:[#allocation8] sm:$0xff]  }
  0x7f   :  { %1718 = vmatpush3.bf16.msra.mxu0 %v226_v9  ;;  %1719 = vmatprep.mubr.msk.bf16.mxu0 %vm2156_vm1, %v2155_v8  ;;  %vm220_vm10 = vcmask 97280   ;;  %v1916_v46 = vld [vmem:[#allocation8 + $0x8] sm:$0xff]   ;;  %v1917_v47 = vld [vmem:[#allocation8 + $0x10] sm:$0xff]   ;;  %v1918_v48 = vld [vmem:[#allocation8 + $0x18] sm:$0xff]   ;;  %vm442_vm11 = vcmask 130048   ;;  %vm313_vm12 = vcmask 261120  }
  0x80   :  { %v123_v5 = vadd.s32 8, %v2330_v3  ;;  %v128_v12 = vand.u32 7, %v2330_v3  ;;  %1739 = vmatprep.subr.bf16.mxu0 %v2155_v8  ;;  %1735 = vmatprep.mubr.msk.bf16.mxu1 %vm2156_vm1, %v2155_v8  ;;  %vm181_vm2 = vcmp.lt.s32.totalorder %v2330_v3, 7  ;;  %vm170_vm5 = vcmp.lt.s32.totalorder %v2330_v3, 1  ;;  %v1610_v49 = vld [vmem:[#allocation13] ss:$0 sm:$0xff] }
  0x81   :  { %158 = vrot.lane.b32.xlu0 %v153_v1, %s2154_s16  ;;  %1724 = vmatpush3.bf16.msra.mxu1 %v1915_v45  ;;  %v1919_v50 = vld [vmem:[#allocation8 + $0x20] sm:$0xff]   ;;  %v1611_v51 = vld [vmem:[#allocation13 + $0x1] ss:$0 sm:$0xff]  ;;  %v1920_v56 = vld [vmem:[#allocation8 + $0x28] sm:$0xff]   ;;  %vm316_vm13 = vcmask 523264   ;;  %vm368_vm14 = vcmask 785408  }
  0x82   :  { %v135_v13 = vand.u32 7, %v123_v5  ;;  %vm2342_vm3 = vcmp.ne.s32.totalorder %v128_v12, 7  ;;  %vm2365_vm6 = vcmp.ne.s32.totalorder %v128_v12, 0  ;;  %1725 = vmatprep.subr.bf16.mxu1 %v2155_v8  ;;  %v1921_v63 = vld [vmem:[#allocation10] sm:$0xff]   ;;  %s2160_s3 = smov 112   ;;  %s2161_s0 = smov 104  }
  0x83   :  { %v1922_v2 = vld [vmem:[#allocation5] sm:$0xff]   ;;  %s2162_s30 = smov 96   ;;  %vm1094_vm15 = vcmask 1043456   ;;  %s2163_s27 = smov 16   ;;  %vm1514_vm0 = vcmask 195584  }
  0x84   :  { %vm2346_vm4 = vcmp.ne.s32.totalorder %v135_v13, 7  ;;  %vm2369_vm7 = vcmp.ne.s32.totalorder %v135_v13, 0  ;;  %s2164_s17 = smov 24   ;;  %s2165_s18 = smov [#allocation14]  }
  0x85   :  { %1726 = vmatpush3.bf16.msra.mxu1 %v1916_v46  ;;  %s1593_s19 = sshll.u32 %s2165_s18, 4  ;;  %s1594_s19 = int_to_ptr.vmem [resolvable:$true] %s1593_s19 }
  0x86   :  { %1727 = vmatprep.subr.bf16.mxu1 %v2155_v8  ;;  %s2113_s20 = scalar_lea.vmem %s1594_s19, 256  ;;  %p2118_p1 = scmp.lt.s32.totalorder %s1594_s19, %s1594_s19 }
  0x87   :  { %p2114_p0 = scmp.ne.s32.totalorder %s1594_s19, %s2113_s20  ;;  %p2119_p2 = scmp.lt.s32.totalorder %s2113_s20, %s2113_s20 }
  0x89   :  { %1728 = vmatpush3.bf16.msra.mxu1 %v1917_v47  ;;  %p2120_p3 = por %p2119_p2, %p2118_p1 }
  0x8a   :  { %1729 = vmatprep.subr.bf16.mxu1 %v2155_v8 }
  0x8b   :  { %p2121_p4 = pnand %p2120_p3, %p2114_p0 }
  0x8d   :  { %1730 = vmatpush3.bf16.msra.mxu1 %v1918_v48 }
  0x8e   :  { %1731 = vmatprep.subr.bf16.mxu1 %v2155_v8 }
  0x91   :  { %1732 = vmatpush3.bf16.msra.mxu1 %v1919_v50 }
  0x92   :  { %1733 = vmatprep.subr.bf16.mxu1 %v2155_v8 }
  0x95   :  { %1734 = vmatpush3.bf16.msra.mxu1 %v1920_v56 }
  0x96   :  { %1759 = vmatprep.subr.bf16.mxu1 %v2155_v8 }
  0xef   :  { %v157_v4 = vpop.permute.xlu0 %156 }
  0xf0   :  { %v162_v6 = vmax.bf16 %v157_v4, %v152_v0 }
  0xf2   :  { %v164_v10 = vunpack.c.l.bf16 %v162_v6 }
  0xf3   :  { %v159_v11 = vpop.permute.xlu0 %158 }
  0xf4   :  { %v163_v14 = vmax.bf16 %v159_v11, %v153_v1  ;;  %v168_v16 = vrot.slane %v164_v10, 7  ;;  %v179_v19 = vrot.slane %v164_v10, 1 }
  0xf6   :  { %v165_v15 = vunpack.c.l.bf16 %v163_v14 }
  0xf8   :  { %v169_v20 = vrot.slane %v165_v15, 7  ;;  %v180_v21 = vrot.slane %v165_v15, 1  ;;  %v1879_v22 = vpack.i.bf16 %v165_v15, %v164_v10 }
  0xfa   :  { %1880 = vrot.lane.b32.xlu1 %v1879_v22, %s2148_s14  ;;  %v182_v23 = vsel %vm181_vm2, %v179_v19, %v180_v21  ;;  %v183_v24 = vsel %vm181_vm2, %v180_v21, %v179_v19  ;;  %v171_v25 = vsel %vm170_vm5, %v168_v16, %v169_v20  ;;  %v172_v26 = vsel %vm170_vm5, %v169_v20, %v168_v16  ;;  %s2158_s14 = smov 32  }
  0xfb   :  { %v188_v27 = vsel %vm2342_vm3, %v182_v23, 0.0  ;;  %v189_v28 = vsel %vm2346_vm4, %v183_v24, 0.0  ;;  %v177_v36 = vsel %vm2365_vm6, %v172_v26, 0.0  ;;  %v178_v37 = vsel %vm2369_vm7, %v171_v25, 0.0 }
  0xfc   :  { %v1884_v29 = vpack.i.bf16 %v189_v28, %v188_v27  ;;  %v1923_v27 = vld [vmem:[#allocation11] sm:$0xff]   ;;  %v1924_v28 = vld [vmem:[#allocation11 + $0x8] sm:$0xff]  }
  0xfe   :  { %1885 = vrot.lane.b32.xlu1 %v1884_v29, %s2157_s6 }
 0x16c   :  { %v1881_v30 = vpop.permute.xlu1 %1880 }
 0x16d   :  { %v1883_v33 = vunpack.i.h.bf16 %v1881_v30  ;;  %v1882_v34 = vunpack.i.l.bf16 %v1881_v30  ;;  %v1624_v30 = vld [vmem:[#allocation13 + $0x6] ss:$0 sm:$0xff] }
 0x16f   :  { %v207_v40 = vsel %vm206_vm8, %v177_v36, %v1882_v34  ;;  %v208_v41 = vsel %vm206_vm8, %v178_v37, %v1883_v33 }
 0x170   :  { %v1886_v35 = vpop.permute.xlu1 %1885 }
 0x171   :  { %v1888_v38 = vunpack.i.h.bf16 %v1886_v35  ;;  %v1887_v39 = vunpack.i.l.bf16 %v1886_v35 }
 0x173   :  { %v210_v42 = vsel %vm209_vm9, %v207_v40, %v1887_v39  ;;  %v211_v43 = vsel %vm209_vm9, %v208_v41, %v1888_v38  ;;  %v1619_v39 = vld [vmem:[#allocation13 + $0x2] ss:$0 sm:$0xff]  ;;  %v1620_v40 = vld [vmem:[#allocation13 + $0x3] ss:$0 sm:$0xff] }
 0x174   :  { %v212_v44 = vpack.c.bf16 %v211_v43, %v210_v42 }
 0x176   :  { %1720 = vmatmul.mubr.msk.bf16.vlgmr.msra.gmra.mrb[0].mxu0 %vm220_vm10, %v212_v44 }
 0x177   :  { %1741 = vmatprep.mubr.msk.bf16.mxu0 %vm2156_vm1, %v2155_v8  ;;  %1740 = vmatpush3.bf16.msra.mxu0 %v1921_v63 }
 0x178   :  { %1745 = vmatprep.subr.bf16.mxu0 %v2155_v8 }
 0x17e   :  { %1742 = vmatmul.mubr.msk.bf16.vlgmr.msra.gmra.mrb[4].mxu0 %vm442_vm11, %v1922_v2  ;;  %v1625_v2 = vld [vmem:[#allocation13 + $0x7] ss:$0 sm:$0xff] }
 0x17f   :  { %1749 = vmatprep.mubr.msk.bf16.mxu0 %vm2156_vm1, %v2155_v8  ;;  %1746 = vmatpush3.bf16.msra.mxu0 %v1923_v27 }
 0x180   :  { %1747 = vmatprep.subr.bf16.mxu0 %v2155_v8 }
 0x183   :  { %1748 = vmatpush3.bf16.msra.mxu0 %v1924_v28 }
 0x184   :  { %1753 = vmatprep.subr.bf16.mxu0 %v2155_v8 }
 0x249   :  { %v262_v52 = vpop.f32.mrb[0].mxu0 }
 0x24a   :  { %v273_v53 = vmul.f32 %v1610_v49, %v262_v52  ;;  %v1721_v54 = vpop.f32.mrb[1].mxu0 }
 0x24b   :  { %v265_v55 = vpop.f32.mrb[2].mxu0 }
 0x24c   :  { %v279_v57 = vadd.f32 %v1611_v51, %v273_v53  ;;  %v274_v58 = vmul.f32 %v1610_v49, %v265_v55  ;;  %v1722_v59 = vpop.f32.mrb[3].mxu0  ;;  %v1626_v53 = vld [vmem:[#allocation13 + $0x4] ss:$0 sm:$0xff] }
 0x24e   :  { %v281_v60 = vmax.f32 %v279_v57, 0.0  ;;  %v280_v61 = vadd.f32 %v1611_v51, %v274_v58 }
 0x250   :  { %v282_v62 = vmax.f32 %v280_v61, 0.0  ;;  %v285_v0 = vrot.slane %v281_v60, 7  ;;  %v291_v1 = vrot.slane %v281_v60, 1 }
 0x251   :  { %v2415_v29 = vpop.f32.mrb[4].mxu0 }
 0x252   :  { %v286_v4 = vrot.slane %v282_v62, 7  ;;  %v292_v5 = vrot.slane %v282_v62, 1  ;;  %v1889_v6 = vpack.i.bf16 %v282_v62, %v281_v60  ;;  %v492_v31 = vadd.f32 %v1624_v30, %v2415_v29  ;;  %v1743_v32 = vpop.f32.mrb[5].mxu0 }
 0x253   :  { %v2418_v33 = vpop.f32.mrb[6].mxu0 }
 0x254   :  { %1890 = vrot.lane.b32.xlu0 %v1889_v6, %s2158_s14  ;;  %v293_v7 = vsel %vm181_vm2, %v291_v1, %v292_v5  ;;  %v294_v9 = vsel %vm181_vm2, %v292_v5, %v291_v1  ;;  %v287_v10 = vsel %vm170_vm5, %v285_v0, %v286_v4  ;;  %v288_v11 = vsel %vm170_vm5, %v286_v4, %v285_v0  ;;  %v1744_v36 = vpop.f32.mrb[7].mxu0 }
 0x255   :  { %v295_v12 = vsel %vm2342_vm3, %v293_v7, 0.0  ;;  %v296_v13 = vsel %vm2346_vm4, %v294_v9, 0.0  ;;  %v289_v17 = vsel %vm2365_vm6, %v288_v11, 0.0  ;;  %v290_v18 = vsel %vm2369_vm7, %v287_v10, 0.0 }
 0x256   :  { %v1894_v14 = vpack.i.bf16 %v296_v13, %v295_v12  ;;  %v1664_v34 = vpack.c.bf16 %v492_v31, %v492_v31  ;;  %v493_v35 = vadd.f32 %v1624_v30, %v2418_v33 }
 0x258   :  { %1895 = vrot.lane.b32.xlu1 %v1894_v14, %s2147_s13  ;;  %v1665_v37 = vpack.c.bf16 %v493_v35, %v493_v35  ;;  %s2159_s13 = smov 120   ;;  %v629_v52 = vsel %vm209_vm9, %v1664_v34, 0 }
 0x259   :  { %596 = vrot.lane.b32.xlu0 %v1664_v34, %s2159_s13 }
 0x25a   :  { %v675_v38 = vsel %vm209_vm9, %v1665_v37, 0 }
 0x25c   :  { %598 = vrot.lane.b32.xlu1 %v1665_v37, %s2159_s13 }
 0x25d   :  { %600 = vrot.lane.b32.xlu0 %v1664_v34, %s2160_s3 }
 0x260   :  { %602 = vrot.lane.b32.xlu1 %v1665_v37, %s2160_s3 }
 0x2c6   :  { %v1891_v15 = vpop.permute.xlu0 %1890 }
 0x2c7   :  { %v1893_v16 = vunpack.i.h.bf16 %v1891_v15  ;;  %v1892_v19 = vunpack.i.l.bf16 %v1891_v15 }
 0x2c9   :  { %v314_v22 = vsel %vm313_vm12, %v289_v17, %v1892_v19  ;;  %v315_v23 = vsel %vm313_vm12, %v290_v18, %v1893_v16 }
 0x2ca   :  { %v1896_v3 = vpop.permute.xlu1 %1895 }
 0x2cb   :  { %v1898_v20 = vunpack.i.h.bf16 %v1896_v3  ;;  %v1897_v21 = vunpack.i.l.bf16 %v1896_v3  ;;  %v597_v58 = vpop.permute.xlu0 %596 }
 0x2cc   :  { %v721_v62 = vsel %vm209_vm9, %v597_v58, 0 }
 0x2cd   :  { %v317_v24 = vsel %vm316_vm13, %v314_v22, %v1897_v21  ;;  %v318_v25 = vsel %vm316_vm13, %v315_v23, %v1898_v20 }
 0x2ce   :  { %v319_v26 = vpack.c.bf16 %v318_v25, %v317_v24  ;;  %v599_v63 = vpop.permute.xlu1 %598 }
 0x2cf   :  { %v767_v1 = vsel %vm209_vm9, %v599_v63, 0  ;;  %v601_v4 = vpop.permute.xlu0 %600 }
 0x2d0   :  { %1736 = vmatmul.mubr.msk.bf16.vlgmr.msra.gmra.mrb[0].mxu1 %vm368_vm14, %v319_v26  ;;  %v813_v7 = vsel %vm209_vm9, %v601_v4, 0 }
 0x2d1   :  { %1761 = vmatprep.mubr.msk.bf16.mxu1 %vm2156_vm1, %v2155_v8  ;;  %1760 = vmatpush3.bf16.xpose.msra.mxu1 %v675_v38 }
 0x2d2   :  { %1771 = vmatprep.subr.bf16.mxu1 %v2155_v8  ;;  %v603_v5 = vpop.permute.xlu1 %602 }
 0x2d3   :  { %v859_v10 = vsel %vm209_vm9, %v603_v5, 0 }
 0x3a3   :  { %v406_v41 = vpop.f32.mrb[0].mxu1 }
 0x3a4   :  { %v417_v42 = vmul.f32 %v1619_v39, %v406_v41  ;;  %v1737_v43 = vpop.f32.mrb[1].mxu1 }
 0x3a5   :  { %v409_v44 = vpop.f32.mrb[2].mxu1 }
 0x3a6   :  { %v2427_v45 = vadd.f32 %v1620_v40, %v417_v42  ;;  %v418_v46 = vmul.f32 %v1619_v39, %v409_v44  ;;  %v1738_v47 = vpop.f32.mrb[3].mxu1 }
 0x3a8   :  { %v2429_v48 = vadd.f32 %v1620_v40, %v418_v46  ;;  %v425_v49 = vmax.f32 %v2427_v45, 0.0 }
 0x3aa   :  { %v426_v50 = vmax.f32 %v2429_v48, 0.0 }
 0x3ac   :  { %v511_v51 = vpack.c.bf16 %v426_v50, %v425_v49 }
 0x3ae   :  { %1750 = vmatmul.mubr.msk.bf16.vlgmr.msra.gmra.mrb[8].mxu0 %vm313_vm12, %v511_v51 }
 0x3af   :  { %1754 = vmatpush3.bf16.xpose.msra.mxu0 %v629_v52  ;;  %1755 = vmatprep.mubr.msk.bf16.mxu0 %vm2156_vm1, %v2155_v8 }
 0x3b0   :  { %1765 = vmatprep.subr.bf16.mxu0 %v2155_v8 }
 0x481   :  { %v566_v54 = vpop.f32.mrb[8].mxu0 }
 0x482   :  { %v567_v55 = vadd.f32 %v1626_v53, %v566_v54  ;;  %v1751_v56 = vpop.f32.mrb[9].mxu0 }
 0x483   :  { %v569_v57 = vpop.f32.mrb[10].mxu0 }
 0x484   :  { %v1662_v59 = vpack.c.bf16 %v567_v55, %v567_v55  ;;  %v570_v60 = vadd.f32 %v1626_v53, %v569_v57  ;;  %v1752_v61 = vpop.f32.mrb[11].mxu0 }
 0x486   :  { %v1663_v0 = vpack.c.bf16 %v570_v60, %v570_v60  ;;  %579 = vrot.lane.b32.xlu0 %v1662_v59, %s2159_s13  ;;  %1756 = vmatmul.mubr.msk.bf16.vlgmr.msra.gmra.mrb[12].mxu0 %vm209_vm9, %v1662_v59 }
 0x487   :  { %1766 = vmatpush3.bf16.xpose.msra.mxu0 %v721_v62  ;;  %1767 = vmatprep.mubr.msk.bf16.mxu0 %vm2156_vm1, %v2155_v8 }
 0x488   :  { %581 = vrot.lane.b32.xlu1 %v1663_v0, %s2159_s13  ;;  %1762 = vmatmul.mubr.msk.bf16.vlgmr.msra.gmra.mrb[4].mxu1 %vm209_vm9, %v1663_v0 }
 0x489   :  { %1772 = vmatpush3.bf16.xpose.msra.mxu1 %v767_v1  ;;  %1777 = vmatprep.subr.bf16.mxu0 %v2155_v8 }
 0x48a   :  { %583 = vrot.lane.b32.xlu0 %v1662_v59, %s2160_s3  ;;  %1773 = vmatprep.mubr.msk.bf16.mxu1 %vm2156_vm1, %v2155_v8 }
 0x48b   :  { %1783 = vmatprep.subr.bf16.mxu1 %v2155_v8 }
 0x48c   :  { %585 = vrot.lane.b32.xlu1 %v1663_v0, %s2160_s3 }
 0x48e   :  { %604 = vrot.lane.b32.xlu0 %v1664_v34, %s2161_s0 }
 0x490   :  { %606 = vrot.lane.b32.xlu1 %v1665_v37, %s2161_s0 }
 0x492   :  { %587 = vrot.lane.b32.xlu0 %v1662_v59, %s2161_s0 }
 0x494   :  { %589 = vrot.lane.b32.xlu1 %v1663_v0, %s2161_s0 }
 0x496   :  { %501 = vrot.lane.b32.xlu0 %v1625_v2, %s2158_s14 }
 0x4f8   :  { %v580_v6 = vpop.permute.xlu0 %579 }
 0x4f9   :  { %1768 = vmatmul.mubr.msk.bf16.vlgmr.msra.gmra.mrb[16].mxu0 %vm209_vm9, %v580_v6 }
 0x4fa   :  { %1778 = vmatpush3.bf16.xpose.msra.mxu0 %v813_v7  ;;  %v582_v9 = vpop.permute.xlu1 %581  ;;  %1779 = vmatprep.mubr.msk.bf16.mxu0 %vm2156_vm1, %v2155_v8 }
 0x4fb   :  { %1774 = vmatmul.mubr.msk.bf16.vlgmr.msra.gmra.mrb[8].mxu1 %vm209_vm9, %v582_v9  ;;  %1789 = vmatprep.subr.bf16.mxu0 %v2155_v8 }
 0x4fc   :  { %1784 = vmatpush3.bf16.xpose.msra.mxu1 %v859_v10  ;;  %v584_v11 = vpop.permute.xlu0 %583  ;;  %1785 = vmatprep.mubr.msk.bf16.mxu1 %vm2156_vm1, %v2155_v8 }
 0x4fd   :  { %1795 = vmatprep.subr.bf16.mxu1 %v2155_v8 }
 0x4fe   :  { %v586_v12 = vpop.permute.xlu1 %585 }
 0x500   :  { %v605_v13 = vpop.permute.xlu0 %604 }
 0x501   :  { %v905_v14 = vsel %vm209_vm9, %v605_v13, 0  ;;  %1780 = vmatmul.mubr.msk.bf16.vlgmr.msra.gmra.mrb[20].mxu0 %vm209_vm9, %v584_v11 }
 0x502   :  { %1790 = vmatpush3.bf16.xpose.msra.mxu0 %v905_v14  ;;  %v607_v15 = vpop.permute.xlu1 %606  ;;  %1791 = vmatprep.mubr.msk.bf16.mxu0 %vm2156_vm1, %v2155_v8 }
 0x503   :  { %v951_v16 = vsel %vm209_vm9, %v607_v15, 0  ;;  %1786 = vmatmul.mubr.msk.bf16.vlgmr.msra.gmra.mrb[12].mxu1 %vm209_vm9, %v586_v12  ;;  %1801 = vmatprep.subr.bf16.mxu0 %v2155_v8 }
 0x504   :  { %v588_v19 = vpop.permute.xlu0 %587  ;;  %1796 = vmatpush3.bf16.xpose.msra.mxu1 %v951_v16  ;;  %1797 = vmatprep.mubr.msk.bf16.mxu1 %vm2156_vm1, %v2155_v8 }
 0x505   :  { %1807 = vmatprep.subr.bf16.mxu1 %v2155_v8 }
 0x506   :  { %v590_v20 = vpop.permute.xlu1 %589 }
 0x508   :  { %v502_v3 = vpop.permute.xlu0 %501 }
 0x509   :  { %v504_v17 = vadd.f32 %v502_v3, %v2415_v29  ;;  %v505_v18 = vadd.f32 %v502_v3, %v2418_v33  ;;  %1792 = vmatmul.mubr.msk.bf16.vlgmr.msra.gmra.mrb[24].mxu0 %vm209_vm9, %v588_v19 }
 0x50a   :  { %1803 = vmatprep.mubr.msk.bf16.mxu0 %vm2156_vm1, %v2155_v8 }
 0x50b   :  { %v1666_v21 = vpack.c.bf16 %v504_v17, %v504_v17  ;;  %v1667_v22 = vpack.c.bf16 %v505_v18, %v505_v18  ;;  %1798 = vmatmul.mubr.msk.bf16.vlgmr.msra.gmra.mrb[16].mxu1 %vm209_vm9, %v590_v20 }
 0x50c   :  { %1809 = vmatprep.mubr.msk.bf16.mxu1 %vm2156_vm1, %v2155_v8 }
 0x50d   :  { %613 = vrot.lane.b32.xlu0 %v1666_v21, %s2159_s13  ;;  %615 = vrot.lane.b32.xlu1 %v1667_v22, %s2159_s13 }
 0x511   :  { %619 = vrot.lane.b32.xlu0 %v1667_v22, %s2160_s3  ;;  %617 = vrot.lane.b32.xlu1 %v1666_v21, %s2160_s3 }
 0x515   :  { %623 = vrot.lane.b32.xlu0 %v1667_v22, %s2161_s0  ;;  %621 = vrot.lane.b32.xlu1 %v1666_v21, %s2161_s0 }
 0x519   :  { %1089 = vrot.lane.b32.xlu0 %v1666_v21, %s2162_s30  ;;  %1138 = vrot.lane.b32.xlu1 %v1667_v22, %s2162_s30 }
 0x559   :  { %v2497_v23 = vpop.f32.mrb[12].mxu0 }
 0x55a   :  { %v1757_v24 = vpop.f32.mrb[13].mxu0  ;;  %v993_v25 = vsel %vm209_vm9, %v2497_v23, -inf }
 0x55b   :  { %v2501_v26 = vpop.f32.mrb[4].mxu1  ;;  %994 = vmax.xlane.f32.xlu1 %v993_v25  ;;  %v668_v27 = vpop.f32.mrb[14].mxu0 }
 0x55c   :  { %v1758_v28 = vpop.f32.mrb[15].mxu0  ;;  %v1763_v29 = vpop.f32.mrb[5].mxu1  ;;  %v996_v30 = vsel %vm209_vm9, %v2501_v26, -inf }
 0x55d   :  { %997 = vmax.xlane.f32.xlu0 %v996_v30  ;;  %v714_v31 = vpop.f32.mrb[6].mxu1 }
 0x55e   :  { %v1764_v32 = vpop.f32.mrb[7].mxu1 }
 0x57f   :  { %v614_v33 = vpop.permute.xlu0 %613  ;;  %v616_v34 = vpop.permute.xlu1 %615 }
 0x580   :  { %v1646_v15 = vcombine.low %v614_v33, %v614_v33  ;;  %v1648_v16 = vcombine.low %v616_v34, %v616_v34 }
 0x583   :  { %v2505_v35 = vpop.permute.xlu0 %619  ;;  %v2507_v36 = vpop.permute.xlu1 %617 }
 0x584   :  { %v1650_v28 = vcombine.low %v2507_v36, %v2507_v36 }
 0x587   :  { %v2509_v37 = vpop.permute.xlu0 %623  ;;  %v2511_v38 = vpop.permute.xlu1 %621 }
 0x58b   :  { %v1090_v39 = vpop.permute.xlu0 %1089  ;;  %v1139_v40 = vpop.permute.xlu1 %1138 }
 0x58c   :  { %v1096_v41 = vsel %vm1094_vm15, %v1090_v39, 0  ;;  %v1144_v42 = vsel %vm1094_vm15, %v1139_v40, 0 }
 0x58d   :  { %1802 = vmatpush3.bf16.msra.mxu0 %v1096_v41  ;;  %1808 = vmatpush3.bf16.msra.mxu1 %v1144_v42 }
 0x58e   :  { %1819 = vmatprep.subr.bf16.mxu1 %v2155_v8  ;;  %1813 = vmatprep.subr.bf16.mxu0 %v2155_v8 }
 0x5cc   :  { %v757_v43 = vpop.f32.mrb[16].mxu0 }
 0x5cd   :  { %v1769_v44 = vpop.f32.mrb[17].mxu0  ;;  %v999_v46 = vsel %vm209_vm9, %v757_v43, -inf }
 0x5ce   :  { %v803_v47 = vpop.f32.mrb[8].mxu1  ;;  %1000 = vmax.xlane.f32.xlu0 %v999_v46  ;;  %v760_v51 = vpop.f32.mrb[18].mxu0 }
 0x5cf   :  { %v1770_v52 = vpop.f32.mrb[19].mxu0  ;;  %v1775_v53 = vpop.f32.mrb[9].mxu1  ;;  %v1002_v54 = vsel %vm209_vm9, %v803_v47, -inf }
 0x5d0   :  { %v806_v55 = vpop.f32.mrb[10].mxu1  ;;  %1003 = vmax.xlane.f32.xlu1 %v1002_v54  ;;  %v1652_v54 = vcombine.low %v2505_v35, %v2505_v35 }
 0x5d1   :  { %v1776_v56 = vpop.f32.mrb[11].mxu1 }
 0x5d4   :  { %v2519_v57 = vpop.f32.mrb[20].mxu0 }
 0x5d5   :  { %v1781_v58 = vpop.f32.mrb[21].mxu0  ;;  %v1005_v59 = vsel %vm209_vm9, %v2519_v57, -inf }
 0x5d6   :  { %v895_v60 = vpop.f32.mrb[12].mxu1  ;;  %1006 = vmax.xlane.f32.xlu0 %v1005_v59  ;;  %v852_v61 = vpop.f32.mrb[22].mxu0  ;;  %v1654_v59 = vcombine.low %v2511_v38, %v2511_v38 }
 0x5d7   :  { %v1782_v62 = vpop.f32.mrb[23].mxu0  ;;  %v1787_v63 = vpop.f32.mrb[13].mxu1  ;;  %v1008_v0 = vsel %vm209_vm9, %v895_v60, -inf }
 0x5d8   :  { %v898_v1 = vpop.f32.mrb[14].mxu1  ;;  %1009 = vmax.xlane.f32.xlu1 %v1008_v0 }
 0x5d9   :  { %v1788_v2 = vpop.f32.mrb[15].mxu1 }
 0x5dc   :  { %v2524_v4 = vpop.f32.mrb[24].mxu0 }
 0x5dd   :  { %v1793_v5 = vpop.f32.mrb[25].mxu0  ;;  %v1011_v6 = vsel %vm209_vm9, %v2524_v4, -inf }
 0x5de   :  { %v987_v7 = vpop.f32.mrb[16].mxu1  ;;  %1012 = vmax.xlane.f32.xlu0 %v1011_v6  ;;  %v944_v9 = vpop.f32.mrb[26].mxu0 }
 0x5df   :  { %v1794_v10 = vpop.f32.mrb[27].mxu0  ;;  %v1799_v11 = vpop.f32.mrb[17].mxu1  ;;  %v1014_v12 = vsel %vm209_vm9, %v987_v7, -inf }
 0x5e0   :  { %v990_v13 = vpop.f32.mrb[18].mxu1  ;;  %1015 = vmax.xlane.f32.xlu1 %v1014_v12 }
 0x5e1   :  { %v1800_v14 = vpop.f32.mrb[19].mxu1 }
 0x5e2   :  { %v1656_v14 = vcombine.low %v2509_v37, %v2509_v37 }
 0x5e8   :  { %v995_v3 = vpop.xlane.xlu1 %994 }
 0x5e9   :  { %v1017_v18 = vsub.f32 %v2497_v23, %v995_v3 }
 0x5ea   :  { %v998_v19 = vpop.xlane.xlu0 %997 }
 0x5eb   :  { %v1018_v17 = vsub.f32 %v2501_v26, %v998_v19  ;;  %v1025_v21 = vmul.f32 1.442695, %v1017_v18 }
 0x5ed   :  { %v1027_v20 = vmul.f32 1.442695, %v1018_v17 }
 0x5ef   :  { %1927 = vpow2.f32 %v1027_v20 }
 0x5f0   :  { %1929 = vpow2.f32 %v1025_v21 }
 0x5f1   :  { %1188 = vrot.lane.b32.xlu1 %v1646_v15, %s2162_s30 }
 0x5f4   :  { %1238 = vrot.lane.b32.xlu0 %v1648_v16, %s2162_s30 }
 0x5f9   :  { %v1928_v22 = vpop.eup %1927 }
 0x5fa   :  { %v1930_v24 = vpop.eup %1929  ;;  %v1044_v25 = vsel %vm209_vm9, %v1928_v22, 0.0 }
 0x5fb   :  { %v1041_v27 = vsel %vm209_vm9, %v1930_v24, 0.0 }
 0x613   :  { %1045 = vadd.xlane.f32.xlu0 %v1044_v25 }
 0x615   :  { %1042 = vadd.xlane.f32.xlu1 %v1041_v27 }
 0x626   :  { %1288 = vrot.lane.b32.xlu1 %v1650_v28, %s2162_s30 }
 0x65b   :  { %v1001_v26 = vpop.xlane.xlu0 %1000 }
 0x65c   :  { %v1019_v29 = vsub.f32 %v757_v43, %v1001_v26 }
 0x65d   :  { %v1004_v23 = vpop.xlane.xlu1 %1003 }
 0x65e   :  { %v1029_v30 = vmul.f32 1.442695, %v1019_v29  ;;  %v1020_v31 = vsub.f32 %v803_v47, %v1004_v23 }
 0x660   :  { %1931 = vpow2.f32 %v1029_v30  ;;  %v1031_v32 = vmul.f32 1.442695, %v1020_v31 }
 0x662   :  { %1933 = vpow2.f32 %v1031_v32 }
 0x663   :  { %v1007_v55 = vpop.xlane.xlu0 %1006 }
 0x664   :  { %v1021_v56 = vsub.f32 %v2519_v57, %v1007_v55 }
 0x665   :  { %v1010_v33 = vpop.xlane.xlu1 %1009 }
 0x666   :  { %v1022_v34 = vsub.f32 %v895_v60, %v1010_v33  ;;  %v1033_v60 = vmul.f32 1.442695, %v1021_v56 }
 0x668   :  { %v1035_v39 = vmul.f32 1.442695, %v1022_v34 }
 0x66a   :  { %v2538_v40 = vpop.eup %1931  ;;  %1935 = vpow2.f32 %v1035_v39 }
 0x66b   :  { %v1047_v41 = vsel %vm209_vm9, %v2538_v40, 0.0  ;;  %v1013_v58 = vpop.xlane.xlu0 %1012 }
 0x66c   :  { %v2542_v36 = vpop.eup %1933  ;;  %1048 = vadd.xlane.f32.xlu0 %v1047_v41  ;;  %v1023_v61 = vsub.f32 %v2524_v4, %v1013_v58 }
 0x66d   :  { %v1016_v42 = vpop.xlane.xlu1 %1015  ;;  %v1050_v43 = vsel %vm209_vm9, %v2542_v36, 0.0 }
 0x66e   :  { %v1024_v44 = vsub.f32 %v987_v7, %v1016_v42  ;;  %1051 = vadd.xlane.f32.xlu1 %v1050_v43  ;;  %v1037_v62 = vmul.f32 1.442695, %v1023_v61 }
 0x66f   :  { %v1239_v63 = vpop.permute.xlu0 %1238 }
 0x670   :  { %v1039_v46 = vmul.f32 1.442695, %v1024_v44  ;;  %v1244_v11 = vsel %vm1094_vm15, %v1239_v63, 0 }
 0x671   :  { %v1189_v35 = vpop.permute.xlu1 %1188 }
 0x672   :  { %1937 = vpow2.f32 %v1039_v46  ;;  %v1194_v13 = vsel %vm1094_vm15, %v1189_v35, 0 }
 0x673   :  { %1939 = vpow2.f32 %v1033_v60 }
 0x674   :  { %v2546_v47 = vpop.eup %1935  ;;  %1941 = vpow2.f32 %v1037_v62 }
 0x675   :  { %v1056_v51 = vsel %vm209_vm9, %v2546_v47, 0.0 }
 0x676   :  { %1057 = vadd.xlane.f32.xlu1 %v1056_v51 }
 0x67c   :  { %v2550_v52 = vpop.eup %1937 }
 0x67d   :  { %v1062_v53 = vsel %vm209_vm9, %v2550_v52, 0.0  ;;  %v2562_v0 = vpop.eup %1939 }
 0x67e   :  { %1063 = vadd.xlane.f32.xlu1 %v1062_v53  ;;  %v1053_v57 = vsel %vm209_vm9, %v2562_v0, 0.0  ;;  %v2566_v2 = vpop.eup %1941 }
 0x67f   :  { %v1059_v4 = vsel %vm209_vm9, %v2566_v2, 0.0 }
 0x682   :  { %1338 = vrot.lane.b32.xlu0 %v1652_v54, %s2162_s30 }
 0x68f   :  { %1388 = vrot.lane.b32.xlu1 %v1654_v59, %s2162_s30 }
 0x6a0   :  { %v1046_v1 = vpop.xlane.xlu0 %1045 }
 0x6a1   :  { %1943 = vrcp.f32 %v1046_v1  ;;  %1054 = vadd.xlane.f32.xlu0 %v1053_v57 }
 0x6a2   :  { %v1043_v38 = vpop.xlane.xlu1 %1042 }
 0x6a3   :  { %1945 = vrcp.f32 %v1043_v38 }
 0x6a5   :  { %1060 = vadd.xlane.f32.xlu0 %v1059_v4 }
 0x6a6   :  { %v1289_v15 = vpop.permute.xlu1 %1288 }
 0x6a7   :  { %v1294_v25 = vsel %vm1094_vm15, %v1289_v15, 0 }
 0x6ab   :  { %v1944_v5 = vpop.eup %1943 }
 0x6ac   :  { %v1074_v6 = vmul.f32 %v1944_v5, %v1928_v22 }
 0x6ad   :  { %v1946_v7 = vpop.eup %1945 }
 0x6ae   :  { %v1073_v9 = vmul.f32 %v1946_v7, %v1930_v24  ;;  %v1082_v10 = vpack.c.bf16 %v1074_v6, %v1074_v6 }
 0x6b0   :  { %1810 = vmatmul.mubr.msk.bf16.vlgmr.msra.gmra.mrb[20].mxu1 %vm209_vm9, %v1082_v10  ;;  %v1081_v12 = vpack.c.bf16 %v1073_v9, %v1073_v9  ;;  %v1925_v9 = vld [vmem:[#allocation11 + $0x10] sm:$0xff]  }
 0x6b1   :  { %1820 = vmatpush3.bf16.msra.mxu1 %v1244_v11  ;;  %1821 = vmatprep.mubr.msk.bf16.mxu1 %vm2156_vm1, %v2155_v8 }
 0x6b2   :  { %1804 = vmatmul.mubr.msk.bf16.vlgmr.msra.gmra.mrb[28].mxu0 %vm209_vm9, %v1081_v12  ;;  %1831 = vmatprep.subr.bf16.mxu1 %v2155_v8 }
 0x6b3   :  { %1814 = vmatpush3.bf16.msra.mxu0 %v1194_v13  ;;  %1815 = vmatprep.mubr.msk.bf16.mxu0 %vm2156_vm1, %v2155_v8  ;;  %v1926_v13 = vld [vmem:[#allocation11 + $0x18] sm:$0xff]  }
 0x6b4   :  { %1825 = vmatprep.subr.bf16.mxu0 %v2155_v8 }
 0x6bb   :  { %1438 = vrot.lane.b32.xlu0 %v1656_v14, %s2162_s30 }
 0x6f9   :  { %v1049_v16 = vpop.xlane.xlu0 %1048 }
 0x6fa   :  { %1947 = vrcp.f32 %v1049_v16 }
 0x6fb   :  { %v1052_v19 = vpop.xlane.xlu1 %1051 }
 0x6fc   :  { %1949 = vrcp.f32 %v1052_v19 }
 0x6fd   :  { %v1339_v24 = vpop.permute.xlu0 %1338 }
 0x6fe   :  { %v1344_v27 = vsel %vm1094_vm15, %v1339_v24, 0 }
 0x703   :  { %v1058_v3 = vpop.xlane.xlu1 %1057 }
 0x704   :  { %v1948_v17 = vpop.eup %1947  ;;  %1951 = vrcp.f32 %v1058_v3 }
 0x705   :  { %v1075_v18 = vmul.f32 %v1948_v17, %v2538_v40 }
 0x706   :  { %v1950_v20 = vpop.eup %1949 }
 0x707   :  { %v1076_v21 = vmul.f32 %v1950_v20, %v2542_v36  ;;  %v1083_v22 = vpack.c.bf16 %v1075_v18, %v1075_v18 }
 0x709   :  { %1816 = vmatmul.mubr.msk.bf16.vlgmr.msra.gmra.mrb[32].mxu0 %vm209_vm9, %v1083_v22  ;;  %v1084_v37 = vpack.c.bf16 %v1076_v21, %v1076_v21 }
 0x70a   :  { %1826 = vmatpush3.bf16.msra.mxu0 %v1294_v25  ;;  %1827 = vmatprep.mubr.msk.bf16.mxu0 %vm2156_vm1, %v2155_v8 }
 0x70b   :  { %1822 = vmatmul.mubr.msk.bf16.vlgmr.msra.gmra.mrb[24].mxu1 %vm209_vm9, %v1084_v37  ;;  %1837 = vmatprep.subr.bf16.mxu0 %v2155_v8  ;;  %v1064_v23 = vpop.xlane.xlu1 %1063 }
 0x70c   :  { %1832 = vmatpush3.bf16.msra.mxu1 %v1344_v27  ;;  %1833 = vmatprep.mubr.msk.bf16.mxu1 %vm2156_vm1, %v2155_v8  ;;  %1953 = vrcp.f32 %v1064_v23 }
 0x70d   :  { %1843 = vmatprep.subr.bf16.mxu1 %v2155_v8 }
 0x70e   :  { %v1952_v28 = vpop.eup %1951 }
 0x70f   :  { %v1078_v26 = vmul.f32 %v1952_v28, %v2546_v47  ;;  %v1389_v42 = vpop.permute.xlu1 %1388 }
 0x710   :  { %v1394_v46 = vsel %vm1094_vm15, %v1389_v42, 0 }
 0x711   :  { %v1086_v29 = vpack.c.bf16 %v1078_v26, %v1078_v26 }
 0x713   :  { %1834 = vmatmul.mubr.msk.bf16.vlgmr.msra.gmra.mrb[28].mxu1 %vm209_vm9, %v1086_v29 }
 0x714   :  { %1845 = vmatprep.mubr.msk.bf16.mxu1 %vm2156_vm1, %v2155_v8 }
 0x716   :  { %v1954_v31 = vpop.eup %1953 }
 0x717   :  { %v1080_v33 = vmul.f32 %v1954_v31, %v2550_v52 }
 0x719   :  { %v1088_v41 = vpack.c.bf16 %v1080_v33, %v1080_v33 }
 0x72e   :  { %v1055_v30 = vpop.xlane.xlu0 %1054 }
 0x72f   :  { %1955 = vrcp.f32 %v1055_v30 }
 0x732   :  { %v1061_v32 = vpop.xlane.xlu0 %1060 }
 0x733   :  { %1957 = vrcp.f32 %v1061_v32 }
 0x736   :  { %v1439_v34 = vpop.permute.xlu0 %1438 }
 0x737   :  { %v1444_v39 = vsel %vm1094_vm15, %v1439_v34, 0 }
 0x738   :  { %1844 = vmatpush3.bf16.msra.mxu1 %v1444_v39 }
 0x739   :  { %v1956_v40 = vpop.eup %1955 }
 0x73a   :  { %v1077_v36 = vmul.f32 %v1956_v40, %v2562_v0 }
 0x73b   :  { %1846 = vmatmul.mubr.msk.bf16.vlgmr.msra.gmra.mrb[32].mxu1 %vm209_vm9, %v1088_v41 }
 0x73c   :  { %v1085_v43 = vpack.c.bf16 %v1077_v36, %v1077_v36  ;;  %v1658_v36 = vld [vmem:[#allocation13 + $0x5] ss:$0 sm:$0xff] }
 0x73d   :  { %v1958_v44 = vpop.eup %1957 }
 0x73e   :  { %1828 = vmatmul.mubr.msk.bf16.vlgmr.msra.gmra.mrb[36].mxu0 %vm209_vm9, %v1085_v43  ;;  %v1079_v47 = vmul.f32 %v1958_v44, %v2566_v2 }
 0x73f   :  { %1838 = vmatpush3.bf16.msra.mxu0 %v1394_v46  ;;  %1839 = vmatprep.mubr.msk.bf16.mxu0 %vm2156_vm1, %v2155_v8 }
 0x740   :  { %1849 = vmatprep.subr.bf16.mxu0 %v2155_v8  ;;  %v1087_v51 = vpack.c.bf16 %v1079_v47, %v1079_v47 }
 0x746   :  { %1840 = vmatmul.mubr.msk.bf16.vlgmr.msra.gmra.mrb[40].mxu0 %vm209_vm9, %v1087_v51 }
 0x747   :  { %1853 = vmatprep.mubr.msk.bf16.mxu0 %vm2156_vm1, %v2155_v8  ;;  %1850 = vmatpush3.bf16.msra.mxu0 %v1925_v9 }
 0x748   :  { %1851 = vmatprep.subr.bf16.mxu0 %v2155_v8 }
 0x74b   :  { %1852 = vmatpush3.bf16.msra.mxu0 %v1926_v13 }
 0x783   :  { %v1180_v52 = vpop.f32.mrb[20].mxu1 }
 0x784   :  { %v1811_v53 = vpop.f32.mrb[21].mxu1 }
 0x785   :  { %v1132_v54 = vpop.f32.mrb[28].mxu0  ;;  %v1183_v55 = vpop.f32.mrb[22].mxu1 }
 0x786   :  { %v1805_v56 = vpop.f32.mrb[29].mxu0  ;;  %v1812_v58 = vpop.f32.mrb[23].mxu1 }
 0x787   :  { %v1135_v59 = vpop.f32.mrb[30].mxu0 }
 0x788   :  { %v1806_v60 = vpop.f32.mrb[31].mxu0 }
 0x7dc   :  { %v1230_v61 = vpop.f32.mrb[32].mxu0 }
 0x7dd   :  { %v1817_v62 = vpop.f32.mrb[33].mxu0 }
 0x7de   :  { %v1233_v63 = vpop.f32.mrb[34].mxu0  ;;  %v1280_v0 = vpop.f32.mrb[24].mxu1 }
 0x7df   :  { %v1899_v35 = vpack.i.bf16 %v1280_v0, %v1230_v61  ;;  %v1818_v1 = vpop.f32.mrb[35].mxu0  ;;  %v1823_v57 = vpop.f32.mrb[25].mxu1 }
 0x7e0   :  { %v1283_v2 = vpop.f32.mrb[26].mxu1 }
 0x7e1   :  { %v1824_v38 = vpop.f32.mrb[27].mxu1  ;;  %1900 = vrot.lane.b32.xlu1 %v1899_v35, %s2157_s6 }
 0x7e6   :  { %v1380_v4 = vpop.f32.mrb[28].mxu1 }
 0x7e7   :  { %v1835_v5 = vpop.f32.mrb[29].mxu1 }
 0x7e8   :  { %v1383_v6 = vpop.f32.mrb[30].mxu1 }
 0x7e9   :  { %v1836_v7 = vpop.f32.mrb[31].mxu1 }
 0x80e   :  { %v1480_v10 = vpop.f32.mrb[32].mxu1 }
 0x80f   :  { %v1847_v11 = vpop.f32.mrb[33].mxu1 }
 0x810   :  { %v1483_v12 = vpop.f32.mrb[34].mxu1 }
 0x811   :  { %v1330_v14 = vpop.f32.mrb[36].mxu0  ;;  %v1848_v15 = vpop.f32.mrb[35].mxu1 }
 0x812   :  { %v1904_v16 = vpack.i.bf16 %v1380_v4, %v1330_v14  ;;  %v1829_v19 = vpop.f32.mrb[37].mxu0 }
 0x813   :  { %v1333_v3 = vpop.f32.mrb[38].mxu0 }
 0x814   :  { %1905 = vrot.lane.b32.xlu0 %v1904_v16, %s2163_s27  ;;  %v1830_v17 = vpop.f32.mrb[39].mxu0 }
 0x819   :  { %v1430_v18 = vpop.f32.mrb[40].mxu0 }
 0x81a   :  { %v1909_v20 = vpack.i.bf16 %v1480_v10, %v1430_v18  ;;  %v1841_v21 = vpop.f32.mrb[41].mxu0 }
 0x81b   :  { %v1433_v22 = vpop.f32.mrb[42].mxu0 }
 0x81c   :  { %1910 = vrot.lane.b32.xlu1 %v1909_v20, %s2164_s17  ;;  %v1842_v8 = vpop.f32.mrb[43].mxu0 }
 0x853   :  { %v1901_v24 = vpop.permute.xlu1 %1900 }
 0x854   :  { %v1903_v37 = vunpack.i.h.bf16 %v1901_v24  ;;  %v1902_v27 = vunpack.i.l.bf16 %v1901_v24 }
 0x856   :  { %v1511_v23 = vsel %vm209_vm9, %v1180_v52, %v1903_v37  ;;  %v1510_v30 = vsel %vm209_vm9, %v1132_v54, %v1902_v27 }
 0x886   :  { %v1906_v25 = vpop.permute.xlu0 %1905 }
 0x887   :  { %v1908_v28 = vunpack.i.h.bf16 %v1906_v25  ;;  %v1907_v26 = vunpack.i.l.bf16 %v1906_v25 }
 0x889   :  { %v1513_v33 = vsel %vm442_vm11, %v1511_v23, %v1908_v28  ;;  %v1512_v34 = vsel %vm442_vm11, %v1510_v30, %v1907_v26 }
 0x88e   :  { %v1911_v29 = vpop.permute.xlu1 %1910 }
 0x88f   :  { %v1913_v31 = vunpack.i.h.bf16 %v1911_v29  ;;  %v1912_v32 = vunpack.i.l.bf16 %v1911_v29 }
 0x891   :  { %v1516_v39 = vsel %vm1514_vm0, %v1513_v33, %v1913_v31  ;;  %v1515_v40 = vsel %vm1514_vm0, %v1512_v34, %v1912_v32 }
 0x892   :  { %v1522_v41 = vpack.c.bf16 %v1516_v39, %v1515_v40 }
 0x894   :  { %1854 = vmatmul.mubr.msk.bf16.vlgmr.msra.gmra.mrb[44].mxu0 %vm313_vm12, %v1522_v41 }
 0x967   :  { %v1577_v42 = vpop.f32.mrb[44].mxu0 }
 0x968   :  { %v1578_v43 = vadd.f32 %v1658_v36, %v1577_v42  ;;  %v1855_v44 = vpop.f32.mrb[45].mxu0 }
 0x969   :  { %v1580_v46 = vpop.f32.mrb[46].mxu0 }
 0x96a   :  { %v1584_v47 = vadd.f32 %v1578_v43, %v425_v49  ;;  %v1581_v51 = vadd.f32 %v1658_v36, %v1580_v46  ;;  %v1856_v52 = vpop.f32.mrb[47].mxu0 }
 0x96c   :  { %1586 = vst.msk [vmem:[#allocation14] sm:$0xff] %vm313_vm12, %v1584_v47  ;;  %v1585_v53 = vadd.f32 %v1581_v51, %v426_v50 }
 0x96e   :  { %1587 = vst.msk [vmem:[#allocation14 + $0x8] sm:$0xff] %vm313_vm12, %v1585_v53 }
 0x96f   :  { %2124 = shalt.err (!%p2121_p4)
}
 0x970   :  { %s2125_s23 = scalar_lea.hbm %s2645_s7, 256 }
 0x971   :  { %p2126_p5 = scmp.ne.s32.totalorder %s2645_s7, %s2125_s23  ;;  %p2129_p6 = scmp.lt.u32.totalorder %s2125_s23, %s2645_s7 }
 0x973   :  { %p2131_p7 = pnand %p2129_p6, %p2126_p5 }
 0x975   :  { %2134 = shalt.err (!%p2131_p7)
}
 0x976   :  { %s2166_s25 = smov 128  }
 0x977   :  { %1599 = dma.vmem_to_hbm [thread:$0]  %s1594_s19, 256, %s2645_s7, [#allocation4], %s2166_s25, %s2166_s25, %s2157_s6  }
 0x978   :  { %2143 = dma.done.wait [#allocation4], 256  }
 0x979   :  { %2144 = vsyncadd [#allocation4], 4294967040 }
 0x97a   :  { %1603 = vsyncpa [#allocation3], 1 }
 0x97b   :  { %1604 = vsyncpa [#allocation6], 1 }
 0x97c   :  { %1605 = vsyncpa [#allocation9], 1 }
 0x97d   :  { %1606 = vsyncpa [#allocation12], 1 }
 0x97e   :  { %1607 = vsyncpa [#allocation4], 1 }

// kernel: tpu_custom_call.1
= control target key start
LH: loop header
LB: loop body
LE: loop exit
PB: predicated region body
PF: predicated region fallthrough
CT: control target
= control target key end

     0   :  { %12 = vsyncpa [#allocation3], 0  ;;  %s2638_s0 = inlined_call_operand.hbm [shape: bf16[16,8], index: 0, kind: input, shape index: {}]   ;;  %s2639_s1 = inlined_call_operand.hbm [shape: bf16[16,16], index: 1, kind: input, shape index: {}]   ;;  %s2640_s2 = inlined_call_operand.hbm [shape: bf16[12,32], index: 2, kind: input, shape index: {}]   ;;  %s2641_s3 = inlined_call_operand.hbm [shape: bf16[96,32], index: 3, kind: input, shape index: {}]   ;;  %s2642_s4 = inlined_call_operand.hbm [shape: bf16[16,64], index: 4, kind: input, shape index: {}]   ;;  %s2643_s5 = inlined_call_operand.hbm [shape: bf16[2,32,32], index: 5, kind: input, shape index: {}]   ;;  %s2644_s6 = inlined_call_operand.hbm [shape: f32[8,32], index: 6, kind: input, shape index: {}]   ;;  %s2645_s7 = inlined_call_operand.hbm [shape: f32[16,32], index: 7, kind: output, shape index: {}]  }
   0x1   :  { %13 = vsyncpa [#allocation6], 0 }
   0x2   :  { %14 = vsyncpa [#allocation9], 0 }
   0x3   :  { %15 = vsyncpa [#allocation12], 0 }
   0x4   :  { %16 = vsyncpa [#allocation4], 0  ;;  %s2145_s24 = smov [#allocation5]   ;;  %s2146_s26 = smov [#allocation8]  }
   0x5   :  { %s34_s25 = sshll.u32 %s2145_s24, 4  ;;  %s58_s27 = sshll.u32 %s2146_s26, 4  ;;  %s35_s25 = int_to_ptr.vmem [resolvable:$true] %s34_s25  ;;  %s2207_s27 = int_to_ptr.vmem [resolvable:$true] %s58_s27 }
   0x6   :  { %s1959_s30 = scalar_lea.hbm %s2639_s1, 128 }
   0x7   :  { %p1960_p0 = scmp.ne.s32.totalorder %s2639_s1, %s1959_s30  ;;  %p1963_p1 = scmp.lt.u32.totalorder %s1959_s30, %s2639_s1 }
   0x9   :  { %p1965_p2 = pnand %p1963_p1, %p1960_p0 }
   0xb   :  { %1968 = shalt.err (!%p1965_p2)
}
   0xc   :  { %s1969_s12 = scalar_lea.vmem %s35_s25, 128  ;;  %p1974_p4 = scmp.lt.s32.totalorder %s35_s25, %s35_s25 }
   0xd   :  { %p1970_p3 = scmp.ne.s32.totalorder %s35_s25, %s1969_s12  ;;  %p1975_p5 = scmp.lt.s32.totalorder %s1969_s12, %s1969_s12 }
   0xf   :  { %p1976_p6 = por %p1975_p5, %p1974_p4 }
  0x11   :  { %p1977_p7 = pnand %p1976_p6, %p1970_p3 }
  0x13   :  { %1980 = shalt.err (!%p1977_p7)
}
  0x14   :  { %s2147_s13 = smov 64   ;;  %s2148_s14 = smov 4  }
  0x15   :  { %40 = dma.hbm_to_vmem [thread:$0]  %s2639_s1, 128, %s35_s25, [#allocation6], %s2147_s13, %s2147_s13, %s2148_s14  }
  0x16   :  { %s1981_s19 = scalar_lea.hbm %s2641_s3, 768 }
  0x17   :  { %p1982_p8 = scmp.ne.s32.totalorder %s2641_s3, %s1981_s19  ;;  %p1985_p9 = scmp.lt.u32.totalorder %s1981_s19, %s2641_s3 }
  0x19   :  { %p1987_p10 = pnand %p1985_p9, %p1982_p8 }
  0x1b   :  { %1990 = shalt.err (!%p1987_p10)
}
  0x1c   :  { %s1991_s24 = scalar_lea.vmem %s2207_s27, 768  ;;  %p1996_p12 = scmp.lt.s32.totalorder %s2207_s27, %s2207_s27 }
  0x1d   :  { %p1992_p11 = scmp.ne.s32.totalorder %s2207_s27, %s1991_s24  ;;  %p1997_p13 = scmp.lt.s32.totalorder %s1991_s24, %s1991_s24 }
  0x1f   :  { %p1998_p0 = por %p1997_p13, %p1996_p12 }
  0x21   :  { %p1999_p1 = pnand %p1998_p0, %p1992_p11 }
  0x23   :  { %2002 = shalt.err (!%p1999_p1)
}
  0x24   :  { %64 = dma.hbm_to_vmem [thread:$0]  %s2641_s3, 768, %s2207_s27, [#allocation9], %s2147_s13, %s2147_s13, %s2148_s14  }
  0x25   :  { %s2149_s26 = smov [#allocation11]   ;;  %s2150_s29 = smov [#allocation2]  }
  0x26   :  { %s82_s28 = sshll.u32 %s2149_s26, 4  ;;  %s22_s30 = sshll.u32 %s2150_s29, 4  ;;  %s83_s28 = int_to_ptr.vmem [resolvable:$true] %s82_s28  ;;  %s2244_s30 = int_to_ptr.vmem [resolvable:$true] %s22_s30 }
  0x27   :  { %s2003_s10 = scalar_lea.hbm %s2643_s5, 512 }
  0x28   :  { %p2004_p2 = scmp.ne.s32.totalorder %s2643_s5, %s2003_s10  ;;  %p2007_p3 = scmp.lt.u32.totalorder %s2003_s10, %s2643_s5 }
  0x2a   :  { %p2009_p4 = pnand %p2007_p3, %p2004_p2 }
  0x2c   :  { %2012 = shalt.err (!%p2009_p4)
}
  0x2d   :  { %s2013_s3 = scalar_lea.vmem %s83_s28, 512  ;;  %p2018_p6 = scmp.lt.s32.totalorder %s83_s28, %s83_s28 }
  0x2e   :  { %p2014_p5 = scmp.ne.s32.totalorder %s83_s28, %s2013_s3  ;;  %p2019_p7 = scmp.lt.s32.totalorder %s2013_s3, %s2013_s3 }
  0x30   :  { %p2020_p8 = por %p2019_p7, %p2018_p6 }
  0x32   :  { %p2021_p9 = pnand %p2020_p8, %p2014_p5 }
  0x34   :  { %2024 = shalt.err (!%p2021_p9)
}
  0x35   :  { %88 = dma.hbm_to_vmem [thread:$0]  %s2643_s5, 512, %s83_s28, [#allocation12], %s2147_s13, %s2147_s13, %s2148_s14  }
  0x36   :  { %s2025_s20 = scalar_lea.hbm %s2638_s0, 128 }
  0x37   :  { %p2026_p10 = scmp.ne.s32.totalorder %s2638_s0, %s2025_s20  ;;  %p2029_p11 = scmp.lt.u32.totalorder %s2025_s20, %s2638_s0 }
  0x39   :  { %p2031_p12 = pnand %p2029_p11, %p2026_p10 }
  0x3b   :  { %2034 = shalt.err (!%p2031_p12)
}
  0x3c   :  { %s2035_s1 = scalar_lea.vmem %s2244_s30, 128  ;;  %p2040_p0 = scmp.lt.s32.totalorder %s2244_s30, %s2244_s30 }
  0x3d   :  { %p2036_p13 = scmp.ne.s32.totalorder %s2244_s30, %s2035_s1  ;;  %p2041_p1 = scmp.lt.s32.totalorder %s2035_s1, %s2035_s1 }
  0x3f   :  { %p2042_p2 = por %p2041_p1, %p2040_p0 }
  0x41   :  { %p2043_p3 = pnand %p2042_p2, %p2036_p13 }
  0x43   :  { %2046 = shalt.err (!%p2043_p3)
}
  0x44   :  { %28 = dma.hbm_to_vmem [thread:$0]  %s2638_s0, 128, %s2244_s30, [#allocation3], %s2147_s13, %s2147_s13, %s2148_s14  }
  0x45   :  { %s2151_s26 = smov [#allocation7]   ;;  %s2152_s29 = smov [#allocation10]  }
  0x46   :  { %s46_s28 = sshll.u32 %s2151_s26, 4  ;;  %s70_s8 = sshll.u32 %s2152_s29, 4  ;;  %s47_s28 = int_to_ptr.vmem [resolvable:$true] %s46_s28  ;;  %s2281_s8 = int_to_ptr.vmem [resolvable:$true] %s70_s8 }
  0x47   :  { %s2047_s11 = scalar_lea.hbm %s2640_s2, 128 }
  0x48   :  { %p2048_p4 = scmp.ne.s32.totalorder %s2640_s2, %s2047_s11  ;;  %p2051_p5 = scmp.lt.u32.totalorder %s2047_s11, %s2640_s2 }
  0x4a   :  { %p2053_p6 = pnand %p2051_p5, %p2048_p4 }
  0x4c   :  { %2056 = shalt.err (!%p2053_p6)
}
  0x4d   :  { %s2057_s0 = scalar_lea.vmem %s47_s28, 128  ;;  %p2062_p8 = scmp.lt.s32.totalorder %s47_s28, %s47_s28 }
  0x4e   :  { %p2058_p7 = scmp.ne.s32.totalorder %s47_s28, %s2057_s0  ;;  %p2063_p9 = scmp.lt.s32.totalorder %s2057_s0, %s2057_s0 }
  0x50   :  { %p2064_p10 = por %p2063_p9, %p2062_p8 }
  0x52   :  { %p2065_p11 = pnand %p2064_p10, %p2058_p7 }
  0x54   :  { %2068 = shalt.err (!%p2065_p11)
}
  0x55   :  { %52 = dma.hbm_to_vmem [thread:$0]  %s2640_s2, 128, %s47_s28, [#allocation6], %s2147_s13, %s2147_s13, %s2148_s14  }
  0x56   :  { %s2069_s19 = scalar_lea.hbm %s2642_s4, 128 }
  0x57   :  { %p2070_p12 = scmp.ne.s32.totalorder %s2642_s4, %s2069_s19  ;;  %p2073_p13 = scmp.lt.u32.totalorder %s2069_s19, %s2642_s4 }
  0x59   :  { %p2075_p0 = pnand %p2073_p13, %p2070_p12 }
  0x5b   :  { %2078 = shalt.err (!%p2075_p0)
}
  0x5c   :  { %s2079_s24 = scalar_lea.vmem %s2281_s8, 128  ;;  %p2084_p2 = scmp.lt.s32.totalorder %s2281_s8, %s2281_s8 }
  0x5d   :  { %p2080_p1 = scmp.ne.s32.totalorder %s2281_s8, %s2079_s24  ;;  %p2085_p3 = scmp.lt.s32.totalorder %s2079_s24, %s2079_s24 }
  0x5f   :  { %p2086_p4 = por %p2085_p3, %p2084_p2 }
  0x61   :  { %p2087_p5 = pnand %p2086_p4, %p2080_p1 }
  0x63   :  { %2090 = shalt.err (!%p2087_p5)
}
  0x64   :  { %76 = dma.hbm_to_vmem [thread:$0]  %s2642_s4, 128, %s2281_s8, [#allocation9], %s2147_s13, %s2147_s13, %s2148_s14  }
  0x65   :  { %s2153_s5 = smov [#allocation13]   ;;  %s2091_s29 = scalar_lea.hbm %s2644_s6, 128 }
  0x66   :  { %s95_s25 = sshll.u32 %s2153_s5, 4  ;;  %p2092_p6 = scmp.ne.s32.totalorder %s2644_s6, %s2091_s29  ;;  %s96_s25 = int_to_ptr.vmem [resolvable:$true] %s95_s25 }
  0x67   :  { %p2095_p7 = scmp.lt.u32.totalorder %s2091_s29, %s2644_s6 }
  0x69   :  { %p2097_p8 = pnand %p2095_p7, %p2092_p6 }
  0x6b   :  { %2100 = shalt.err (!%p2097_p8)
}
  0x6c   :  { %s2101_s15 = scalar_lea.vmem %s96_s25, 128  ;;  %p2106_p10 = scmp.lt.s32.totalorder %s96_s25, %s96_s25 }
  0x6d   :  { %p2102_p9 = scmp.ne.s32.totalorder %s96_s25, %s2101_s15  ;;  %p2107_p11 = scmp.lt.s32.totalorder %s2101_s15, %s2101_s15 }
  0x6f   :  { %p2108_p12 = por %p2107_p11, %p2106_p10 }
  0x71   :  { %p2109_p13 = pnand %p2108_p12, %p2102_p9 }
  0x73   :  { %2112 = shalt.err (!%p2109_p13)
}
  0x74   :  { %98 = dma.hbm_to_vmem [thread:$0]  %s2644_s6, 128, %s96_s25, [#allocation12]  }
  0x75   :  { %2135 = dma.done.wait [#allocation3], 128  }
  0x76   :  { %2136 = vsyncadd [#allocation3], 4294967168 }
  0x77   :  { %2137 = dma.done.wait [#allocation6], 256  }
  0x78   :  { %2138 = vsyncadd [#allocation6], 4294967040 }
  0x79   :  { %2139 = dma.done.wait [#allocation9], 896  }
  0x7a   :  { %2140 = vsyncadd [#allocation9], 4294966400 }
  0x7b   :  { %2141 = dma.done.wait [#allocation12], 640  }
  0x7c   :  { %2142 = vsyncadd [#allocation12], 4294966656  ;;  %v152_v0 = vld [vmem:[#allocation2] sm:$0xf]  ;;  %s2154_s16 = smov 124   ;;  %v121_v2 = vlaneseq  ;;  %vm224_vm0 = vcmask 1045504  }
  0x7d   :  { %156 = vrot.lane.b32.xlu0 %v152_v0, %s2154_s16  ;;  %v153_v1 = vld [vmem:[#allocation2 + $0x4] sm:$0xf]  ;;  %v1914_v7 = vld [vmem:[#allocation7] sm:$0x3f]   ;;  %v2155_v8 = vmov 0.0   ;;  %vm2156_vm1 = vmmov 0  }
  0x7e   :  { %v2330_v3 = vshrl.u32 %v121_v2, 7  ;;  %1717 = vmatprep.subr.bf16.mxu0 %v2155_v8  ;;  %v226_v9 = vsel %vm224_vm0, %v1914_v7, 0  ;;  %1723 = vmatprep.subr.bf16.mxu1 %v2155_v8  ;;  %s2157_s6 = smov 8   ;;  %vm206_vm8 = vcmask 31744   ;;  %vm209_vm9 = vcmask 64512   ;;  %v1915_v45 = vld [vmem:[#allocation8] sm:$0xff]  }
  0x7f   :  { %1718 = vmatpush3.bf16.msra.mxu0 %v226_v9  ;;  %1719 = vmatprep.mubr.msk.bf16.mxu0 %vm2156_vm1, %v2155_v8  ;;  %vm220_vm10 = vcmask 97280   ;;  %v1916_v46 = vld [vmem:[#allocation8 + $0x8] sm:$0xff]   ;;  %v1917_v47 = vld [vmem:[#allocation8 + $0x10] sm:$0xff]   ;;  %v1918_v48 = vld [vmem:[#allocation8 + $0x18] sm:$0xff]   ;;  %vm442_vm11 = vcmask 130048   ;;  %vm313_vm12 = vcmask 261120  }
  0x80   :  { %v123_v5 = vadd.s32 8, %v2330_v3  ;;  %v128_v12 = vand.u32 7, %v2330_v3  ;;  %1739 = vmatprep.subr.bf16.mxu0 %v2155_v8  ;;  %1735 = vmatprep.mubr.msk.bf16.mxu1 %vm2156_vm1, %v2155_v8  ;;  %vm181_vm2 = vcmp.lt.s32.totalorder %v2330_v3, 7  ;;  %vm170_vm5 = vcmp.lt.s32.totalorder %v2330_v3, 1  ;;  %v1610_v49 = vld [vmem:[#allocation13] ss:$0 sm:$0xff] }
  0x81   :  { %158 = vrot.lane.b32.xlu0 %v153_v1, %s2154_s16  ;;  %1724 = vmatpush3.bf16.msra.mxu1 %v1915_v45  ;;  %v1919_v50 = vld [vmem:[#allocation8 + $0x20] sm:$0xff]   ;;  %v1611_v51 = vld [vmem:[#allocation13 + $0x1] ss:$0 sm:$0xff]  ;;  %v1920_v56 = vld [vmem:[#allocation8 + $0x28] sm:$0xff]   ;;  %vm316_vm13 = vcmask 523264   ;;  %vm368_vm14 = vcmask 785408  }
  0x82   :  { %v135_v13 = vand.u32 7, %v123_v5  ;;  %vm2342_vm3 = vcmp.ne.s32.totalorder %v128_v12, 7  ;;  %vm2365_vm6 = vcmp.ne.s32.totalorder %v128_v12, 0  ;;  %1725 = vmatprep.subr.bf16.mxu1 %v2155_v8  ;;  %v1921_v63 = vld [vmem:[#allocation10] sm:$0xff]   ;;  %s2160_s3 = smov 112   ;;  %s2161_s0 = smov 104  }
  0x83   :  { %v1922_v2 = vld [vmem:[#allocation5] sm:$0xff]   ;;  %s2162_s30 = smov 96   ;;  %vm1094_vm15 = vcmask 1043456   ;;  %s2163_s27 = smov 16   ;;  %vm1514_vm0 = vcmask 195584  }
  0x84   :  { %vm2346_vm4 = vcmp.ne.s32.totalorder %v135_v13, 7  ;;  %vm2369_vm7 = vcmp.ne.s32.totalorder %v135_v13, 0  ;;  %s2164_s17 = smov 24   ;;  %s2165_s18 = smov [#allocation14]  }
  0x85   :  { %1726 = vmatpush3.bf16.msra.mxu1 %v1916_v46  ;;  %s1593_s19 = sshll.u32 %s2165_s18, 4  ;;  %s1594_s19 = int_to_ptr.vmem [resolvable:$true] %s1593_s19 }
  0x86   :  { %1727 = vmatprep.subr.bf16.mxu1 %v2155_v8  ;;  %s2113_s20 = scalar_lea.vmem %s1594_s19, 256  ;;  %p2118_p1 = scmp.lt.s32.totalorder %s1594_s19, %s1594_s19 }
  0x87   :  { %p2114_p0 = scmp.ne.s32.totalorder %s1594_s19, %s2113_s20  ;;  %p2119_p2 = scmp.lt.s32.totalorder %s2113_s20, %s2113_s20 }
  0x89   :  { %1728 = vmatpush3.bf16.msra.mxu1 %v1917_v47  ;;  %p2120_p3 = por %p2119_p2, %p2118_p1 }
  0x8a   :  { %1729 = vmatprep.subr.bf16.mxu1 %v2155_v8 }
  0x8b   :  { %p2121_p4 = pnand %p2120_p3, %p2114_p0 }
  0x8d   :  { %1730 = vmatpush3.bf16.msra.mxu1 %v1918_v48 }
  0x8e   :  { %1731 = vmatprep.subr.bf16.mxu1 %v2155_v8 }
  0x91   :  { %1732 = vmatpush3.bf16.msra.mxu1 %v1919_v50 }
  0x92   :  { %1733 = vmatprep.subr.bf16.mxu1 %v2155_v8 }
  0x95   :  { %1734 = vmatpush3.bf16.msra.mxu1 %v1920_v56 }
  0x96   :  { %1759 = vmatprep.subr.bf16.mxu1 %v2155_v8 }
  0xef   :  { %v157_v4 = vpop.permute.xlu0 %156 }
  0xf0   :  { %v162_v6 = vmax.bf16 %v157_v4, %v152_v0 }
  0xf2   :  { %v164_v10 = vunpack.c.l.bf16 %v162_v6 }
  0xf3   :  { %v159_v11 = vpop.permute.xlu0 %158 }
  0xf4   :  { %v163_v14 = vmax.bf16 %v159_v11, %v153_v1  ;;  %v168_v16 = vrot.slane %v164_v10, 7  ;;  %v179_v19 = vrot.slane %v164_v10, 1 }
  0xf6   :  { %v165_v15 = vunpack.c.l.bf16 %v163_v14 }
  0xf8   :  { %v169_v20 = vrot.slane %v165_v15, 7  ;;  %v180_v21 = vrot.slane %v165_v15, 1  ;;  %v1879_v22 = vpack.i.bf16 %v165_v15, %v164_v10 }
  0xfa   :  { %1880 = vrot.lane.b32.xlu1 %v1879_v22, %s2148_s14  ;;  %v182_v23 = vsel %vm181_vm2, %v179_v19, %v180_v21  ;;  %v183_v24 = vsel %vm181_vm2, %v180_v21, %v179_v19  ;;  %v171_v25 = vsel %vm170_vm5, %v168_v16, %v169_v20  ;;  %v172_v26 = vsel %vm170_vm5, %v169_v20, %v168_v16  ;;  %s2158_s14 = smov 32  }
  0xfb   :  { %v188_v27 = vsel %vm2342_vm3, %v182_v23, 0.0  ;;  %v189_v28 = vsel %vm2346_vm4, %v183_v24, 0.0  ;;  %v177_v36 = vsel %vm2365_vm6, %v172_v26, 0.0  ;;  %v178_v37 = vsel %vm2369_vm7, %v171_v25, 0.0 }
  0xfc   :  { %v1884_v29 = vpack.i.bf16 %v189_v28, %v188_v27  ;;  %v1923_v27 = vld [vmem:[#allocation11] sm:$0xff]   ;;  %v1924_v28 = vld [vmem:[#allocation11 + $0x8] sm:$0xff]  }
  0xfe   :  { %1885 = vrot.lane.b32.xlu1 %v1884_v29, %s2157_s6 }
 0x16c   :  { %v1881_v30 = vpop.permute.xlu1 %1880 }
 0x16d   :  { %v1883_v33 = vunpack.i.h.bf16 %v1881_v30  ;;  %v1882_v34 = vunpack.i.l.bf16 %v1881_v30  ;;  %v1624_v30 = vld [vmem:[#allocation13 + $0x6] ss:$0 sm:$0xff] }
 0x16f   :  { %v207_v40 = vsel %vm206_vm8, %v177_v36, %v1882_v34  ;;  %v208_v41 = vsel %vm206_vm8, %v178_v37, %v1883_v33 }
 0x170   :  { %v1886_v35 = vpop.permute.xlu1 %1885 }
 0x171   :  { %v1888_v38 = vunpack.i.h.bf16 %v1886_v35  ;;  %v1887_v39 = vunpack.i.l.bf16 %v1886_v35 }
 0x173   :  { %v210_v42 = vsel %vm209_vm9, %v207_v40, %v1887_v39  ;;  %v211_v43 = vsel %vm209_vm9, %v208_v41, %v1888_v38  ;;  %v1619_v39 = vld [vmem:[#allocation13 + $0x2] ss:$0 sm:$0xff]  ;;  %v1620_v40 = vld [vmem:[#allocation13 + $0x3] ss:$0 sm:$0xff] }
 0x174   :  { %v212_v44 = vpack.c.bf16 %v211_v43, %v210_v42 }
 0x176   :  { %1720 = vmatmul.mubr.msk.bf16.vlgmr.msra.gmra.mrb[0].mxu0 %vm220_vm10, %v212_v44 }
 0x177   :  { %1741 = vmatprep.mubr.msk.bf16.mxu0 %vm2156_vm1, %v2155_v8  ;;  %1740 = vmatpush3.bf16.msra.mxu0 %v1921_v63 }
 0x178   :  { %1745 = vmatprep.subr.bf16.mxu0 %v2155_v8 }
 0x17e   :  { %1742 = vmatmul.mubr.msk.bf16.vlgmr.msra.gmra.mrb[4].mxu0 %vm442_vm11, %v1922_v2  ;;  %v1625_v2 = vld [vmem:[#allocation13 + $0x7] ss:$0 sm:$0xff] }
 0x17f   :  { %1749 = vmatprep.mubr.msk.bf16.mxu0 %vm2156_vm1, %v2155_v8  ;;  %1746 = vmatpush3.bf16.msra.mxu0 %v1923_v27 }
 0x180   :  { %1747 = vmatprep.subr.bf16.mxu0 %v2155_v8 }
 0x183   :  { %1748 = vmatpush3.bf16.msra.mxu0 %v1924_v28 }
 0x184   :  { %1753 = vmatprep.subr.bf16.mxu0 %v2155_v8 }
 0x249   :  { %v262_v52 = vpop.f32.mrb[0].mxu0 }
 0x24a   :  { %v273_v53 = vmul.f32 %v1610_v49, %v262_v52  ;;  %v1721_v54 = vpop.f32.mrb[1].mxu0 }
 0x24b   :  { %v265_v55 = vpop.f32.mrb[2].mxu0 }
 0x24c   :  { %v279_v57 = vadd.f32 %v1611_v51, %v273_v53  ;;  %v274_v58 = vmul.f32 %v1610_v49, %v265_v55  ;;  %v1722_v59 = vpop.f32.mrb[3].mxu0  ;;  %v1626_v53 = vld [vmem:[#allocation13 + $0x4] ss:$0 sm:$0xff] }
 0x24e   :  { %v281_v60 = vmax.f32 %v279_v57, 0.0  ;;  %v280_v61 = vadd.f32 %v1611_v51, %v274_v58 }
 0x250   :  { %v282_v62 = vmax.f32 %v280_v61, 0.0  ;;  %v285_v0 = vrot.slane %v281_v60, 7  ;;  %v291_v1 = vrot.slane %v281_v60, 1 }
 0x251   :  { %v2415_v29 = vpop.f32.mrb[4].mxu0 }
 0x252   :  { %v286_v4 = vrot.slane %v282_v62, 7  ;;  %v292_v5 = vrot.slane %v282_v62, 1  ;;  %v1889_v6 = vpack.i.bf16 %v282_v62, %v281_v60  ;;  %v492_v31 = vadd.f32 %v1624_v30, %v2415_v29  ;;  %v1743_v32 = vpop.f32.mrb[5].mxu0 }
 0x253   :  { %v2418_v33 = vpop.f32.mrb[6].mxu0 }
 0x254   :  { %1890 = vrot.lane.b32.xlu0 %v1889_v6, %s2158_s14  ;;  %v293_v7 = vsel %vm181_vm2, %v291_v1, %v292_v5  ;;  %v294_v9 = vsel %vm181_vm2, %v292_v5, %v291_v1  ;;  %v287_v10 = vsel %vm170_vm5, %v285_v0, %v286_v4  ;;  %v288_v11 = vsel %vm170_vm5, %v286_v4, %v285_v0  ;;  %v1744_v36 = vpop.f32.mrb[7].mxu0 }
 0x255   :  { %v295_v12 = vsel %vm2342_vm3, %v293_v7, 0.0  ;;  %v296_v13 = vsel %vm2346_vm4, %v294_v9, 0.0  ;;  %v289_v17 = vsel %vm2365_vm6, %v288_v11, 0.0  ;;  %v290_v18 = vsel %vm2369_vm7, %v287_v10, 0.0 }
 0x256   :  { %v1894_v14 = vpack.i.bf16 %v296_v13, %v295_v12  ;;  %v1664_v34 = vpack.c.bf16 %v492_v31, %v492_v31  ;;  %v493_v35 = vadd.f32 %v1624_v30, %v2418_v33 }
 0x258   :  { %1895 = vrot.lane.b32.xlu1 %v1894_v14, %s2147_s13  ;;  %v1665_v37 = vpack.c.bf16 %v493_v35, %v493_v35  ;;  %s2159_s13 = smov 120   ;;  %v629_v52 = vsel %vm209_vm9, %v1664_v34, 0 }
 0x259   :  { %596 = vrot.lane.b32.xlu0 %v1664_v34, %s2159_s13 }
 0x25a   :  { %v675_v38 = vsel %vm209_vm9, %v1665_v37, 0 }
 0x25c   :  { %598 = vrot.lane.b32.xlu1 %v1665_v37, %s2159_s13 }
 0x25d   :  { %600 = vrot.lane.b32.xlu0 %v1664_v34, %s2160_s3 }
 0x260   :  { %602 = vrot.lane.b32.xlu1 %v1665_v37, %s2160_s3 }
 0x2c6   :  { %v1891_v15 = vpop.permute.xlu0 %1890 }
 0x2c7   :  { %v1893_v16 = vunpack.i.h.bf16 %v1891_v15  ;;  %v1892_v19 = vunpack.i.l.bf16 %v1891_v15 }
 0x2c9   :  { %v314_v22 = vsel %vm313_vm12, %v289_v17, %v1892_v19  ;;  %v315_v23 = vsel %vm313_vm12, %v290_v18, %v1893_v16 }
 0x2ca   :  { %v1896_v3 = vpop.permute.xlu1 %1895 }
 0x2cb   :  { %v1898_v20 = vunpack.i.h.bf16 %v1896_v3  ;;  %v1897_v21 = vunpack.i.l.bf16 %v1896_v3  ;;  %v597_v58 = vpop.permute.xlu0 %596 }
 0x2cc   :  { %v721_v62 = vsel %vm209_vm9, %v597_v58, 0 }
 0x2cd   :  { %v317_v24 = vsel %vm316_vm13, %v314_v22, %v1897_v21  ;;  %v318_v25 = vsel %vm316_vm13, %v315_v23, %v1898_v20 }
 0x2ce   :  { %v319_v26 = vpack.c.bf16 %v318_v25, %v317_v24  ;;  %v599_v63 = vpop.permute.xlu1 %598 }
 0x2cf   :  { %v767_v1 = vsel %vm209_vm9, %v599_v63, 0  ;;  %v601_v4 = vpop.permute.xlu0 %600 }
 0x2d0   :  { %1736 = vmatmul.mubr.msk.bf16.vlgmr.msra.gmra.mrb[0].mxu1 %vm368_vm14, %v319_v26  ;;  %v813_v7 = vsel %vm209_vm9, %v601_v4, 0 }
 0x2d1   :  { %1761 = vmatprep.mubr.msk.bf16.mxu1 %vm2156_vm1, %v2155_v8  ;;  %1760 = vmatpush3.bf16.xpose.msra.mxu1 %v675_v38 }
 0x2d2   :  { %1771 = vmatprep.subr.bf16.mxu1 %v2155_v8  ;;  %v603_v5 = vpop.permute.xlu1 %602 }
 0x2d3   :  { %v859_v10 = vsel %vm209_vm9, %v603_v5, 0 }
 0x3a3   :  { %v406_v41 = vpop.f32.mrb[0].mxu1 }
 0x3a4   :  { %v417_v42 = vmul.f32 %v1619_v39, %v406_v41  ;;  %v1737_v43 = vpop.f32.mrb[1].mxu1 }
 0x3a5   :  { %v409_v44 = vpop.f32.mrb[2].mxu1 }
 0x3a6   :  { %v2427_v45 = vadd.f32 %v1620_v40, %v417_v42  ;;  %v418_v46 = vmul.f32 %v1619_v39, %v409_v44  ;;  %v1738_v47 = vpop.f32.mrb[3].mxu1 }
 0x3a8   :  { %v2429_v48 = vadd.f32 %v1620_v40, %v418_v46  ;;  %v425_v49 = vmax.f32 %v2427_v45, 0.0 }
 0x3aa   :  { %v426_v50 = vmax.f32 %v2429_v48, 0.0 }
 0x3ac   :  { %v511_v51 = vpack.c.bf16 %v426_v50, %v425_v49 }
 0x3ae   :  { %1750 = vmatmul.mubr.msk.bf16.vlgmr.msra.gmra.mrb[8].mxu0 %vm313_vm12, %v511_v51 }
 0x3af   :  { %1754 = vmatpush3.bf16.xpose.msra.mxu0 %v629_v52  ;;  %1755 = vmatprep.mubr.msk.bf16.mxu0 %vm2156_vm1, %v2155_v8 }
 0x3b0   :  { %1765 = vmatprep.subr.bf16.mxu0 %v2155_v8 }
 0x481   :  { %v566_v54 = vpop.f32.mrb[8].mxu0 }
 0x482   :  { %v567_v55 = vadd.f32 %v1626_v53, %v566_v54  ;;  %v1751_v56 = vpop.f32.mrb[9].mxu0 }
 0x483   :  { %v569_v57 = vpop.f32.mrb[10].mxu0 }
 0x484   :  { %v1662_v59 = vpack.c.bf16 %v567_v55, %v567_v55  ;;  %v570_v60 = vadd.f32 %v1626_v53, %v569_v57  ;;  %v1752_v61 = vpop.f32.mrb[11].mxu0 }
 0x486   :  { %v1663_v0 = vpack.c.bf16 %v570_v60, %v570_v60  ;;  %579 = vrot.lane.b32.xlu0 %v1662_v59, %s2159_s13  ;;  %1756 = vmatmul.mubr.msk.bf16.vlgmr.msra.gmra.mrb[12].mxu0 %vm209_vm9, %v1662_v59 }
 0x487   :  { %1766 = vmatpush3.bf16.xpose.msra.mxu0 %v721_v62  ;;  %1767 = vmatprep.mubr.msk.bf16.mxu0 %vm2156_vm1, %v2155_v8 }
 0x488   :  { %581 = vrot.lane.b32.xlu1 %v1663_v0, %s2159_s13  ;;  %1762 = vmatmul.mubr.msk.bf16.vlgmr.msra.gmra.mrb[4].mxu1 %vm209_vm9, %v1663_v0 }
 0x489   :  { %1772 = vmatpush3.bf16.xpose.msra.mxu1 %v767_v1  ;;  %1777 = vmatprep.subr.bf16.mxu0 %v2155_v8 }
 0x48a   :  { %583 = vrot.lane.b32.xlu0 %v1662_v59, %s2160_s3  ;;  %1773 = vmatprep.mubr.msk.bf16.mxu1 %vm2156_vm1, %v2155_v8 }
 0x48b   :  { %1783 = vmatprep.subr.bf16.mxu1 %v2155_v8 }
 0x48c   :  { %585 = vrot.lane.b32.xlu1 %v1663_v0, %s2160_s3 }
 0x48e   :  { %604 = vrot.lane.b32.xlu0 %v1664_v34, %s2161_s0 }
 0x490   :  { %606 = vrot.lane.b32.xlu1 %v1665_v37, %s2161_s0 }
 0x492   :  { %587 = vrot.lane.b32.xlu0 %v1662_v59, %s2161_s0 }
 0x494   :  { %589 = vrot.lane.b32.xlu1 %v1663_v0, %s2161_s0 }
 0x496   :  { %501 = vrot.lane.b32.xlu0 %v1625_v2, %s2158_s14 }
 0x4f8   :  { %v580_v6 = vpop.permute.xlu0 %579 }
 0x4f9   :  { %1768 = vmatmul.mubr.msk.bf16.vlgmr.msra.gmra.mrb[16].mxu0 %vm209_vm9, %v580_v6 }
 0x4fa   :  { %1778 = vmatpush3.bf16.xpose.msra.mxu0 %v813_v7  ;;  %v582_v9 = vpop.permute.xlu1 %581  ;;  %1779 = vmatprep.mubr.msk.bf16.mxu0 %vm2156_vm1, %v2155_v8 }
 0x4fb   :  { %1774 = vmatmul.mubr.msk.bf16.vlgmr.msra.gmra.mrb[8].mxu1 %vm209_vm9, %v582_v9  ;;  %1789 = vmatprep.subr.bf16.mxu0 %v2155_v8 }
 0x4fc   :  { %1784 = vmatpush3.bf16.xpose.msra.mxu1 %v859_v10  ;;  %v584_v11 = vpop.permute.xlu0 %583  ;;  %1785 = vmatprep.mubr.msk.bf16.mxu1 %vm2156_vm1, %v2155_v8 }
 0x4fd   :  { %1795 = vmatprep.subr.bf16.mxu1 %v2155_v8 }
 0x4fe   :  { %v586_v12 = vpop.permute.xlu1 %585 }
 0x500   :  { %v605_v13 = vpop.permute.xlu0 %604 }
 0x501   :  { %v905_v14 = vsel %vm209_vm9, %v605_v13, 0  ;;  %1780 = vmatmul.mubr.msk.bf16.vlgmr.msra.gmra.mrb[20].mxu0 %vm209_vm9, %v584_v11 }
 0x502   :  { %1790 = vmatpush3.bf16.xpose.msra.mxu0 %v905_v14  ;;  %v607_v15 = vpop.permute.xlu1 %606  ;;  %1791 = vmatprep.mubr.msk.bf16.mxu0 %vm2156_vm1, %v2155_v8 }
 0x503   :  { %v951_v16 = vsel %vm209_vm9, %v607_v15, 0  ;;  %1786 = vmatmul.mubr.msk.bf16.vlgmr.msra.gmra.mrb[12].mxu1 %vm209_vm9, %v586_v12  ;;  %1801 = vmatprep.subr.bf16.mxu0 %v2155_v8 }
 0x504   :  { %v588_v19 = vpop.permute.xlu0 %587  ;;  %1796 = vmatpush3.bf16.xpose.msra.mxu1 %v951_v16  ;;  %1797 = vmatprep.mubr.msk.bf16.mxu1 %vm2156_vm1, %v2155_v8 }
 0x505   :  { %1807 = vmatprep.subr.bf16.mxu1 %v2155_v8 }
 0x506   :  { %v590_v20 = vpop.permute.xlu1 %589 }
 0x508   :  { %v502_v3 = vpop.permute.xlu0 %501 }
 0x509   :  { %v504_v17 = vadd.f32 %v502_v3, %v2415_v29  ;;  %v505_v18 = vadd.f32 %v502_v3, %v2418_v33  ;;  %1792 = vmatmul.mubr.msk.bf16.vlgmr.msra.gmra.mrb[24].mxu0 %vm209_vm9, %v588_v19 }
 0x50a   :  { %1803 = vmatprep.mubr.msk.bf16.mxu0 %vm2156_vm1, %v2155_v8 }
 0x50b   :  { %v1666_v21 = vpack.c.bf16 %v504_v17, %v504_v17  ;;  %v1667_v22 = vpack.c.bf16 %v505_v18, %v505_v18  ;;  %1798 = vmatmul.mubr.msk.bf16.vlgmr.msra.gmra.mrb[16].mxu1 %vm209_vm9, %v590_v20 }
 0x50c   :  { %1809 = vmatprep.mubr.msk.bf16.mxu1 %vm2156_vm1, %v2155_v8 }
 0x50d   :  { %613 = vrot.lane.b32.xlu0 %v1666_v21, %s2159_s13  ;;  %615 = vrot.lane.b32.xlu1 %v1667_v22, %s2159_s13 }
 0x511   :  { %619 = vrot.lane.b32.xlu0 %v1667_v22, %s2160_s3  ;;  %617 = vrot.lane.b32.xlu1 %v1666_v21, %s2160_s3 }
 0x515   :  { %623 = vrot.lane.b32.xlu0 %v1667_v22, %s2161_s0  ;;  %621 = vrot.lane.b32.xlu1 %v1666_v21, %s2161_s0 }
 0x519   :  { %1089 = vrot.lane.b32.xlu0 %v1666_v21, %s2162_s30  ;;  %1138 = vrot.lane.b32.xlu1 %v1667_v22, %s2162_s30 }
 0x559   :  { %v2497_v23 = vpop.f32.mrb[12].mxu0 }
 0x55a   :  { %v1757_v24 = vpop.f32.mrb[13].mxu0  ;;  %v993_v25 = vsel %vm209_vm9, %v2497_v23, -inf }
 0x55b   :  { %v2501_v26 = vpop.f32.mrb[4].mxu1  ;;  %994 = vmax.xlane.f32.xlu1 %v993_v25  ;;  %v668_v27 = vpop.f32.mrb[14].mxu0 }
 0x55c   :  { %v1758_v28 = vpop.f32.mrb[15].mxu0  ;;  %v1763_v29 = vpop.f32.mrb[5].mxu1  ;;  %v996_v30 = vsel %vm209_vm9, %v2501_v26, -inf }
 0x55d   :  { %997 = vmax.xlane.f32.xlu0 %v996_v30  ;;  %v714_v31 = vpop.f32.mrb[6].mxu1 }
 0x55e   :  { %v1764_v32 = vpop.f32.mrb[7].mxu1 }
 0x57f   :  { %v614_v33 = vpop.permute.xlu0 %613  ;;  %v616_v34 = vpop.permute.xlu1 %615 }
 0x580   :  { %v1646_v15 = vcombine.low %v614_v33, %v614_v33  ;;  %v1648_v16 = vcombine.low %v616_v34, %v616_v34 }
 0x583   :  { %v2505_v35 = vpop.permute.xlu0 %619  ;;  %v2507_v36 = vpop.permute.xlu1 %617 }
 0x584   :  { %v1650_v28 = vcombine.low %v2507_v36, %v2507_v36 }
 0x587   :  { %v2509_v37 = vpop.permute.xlu0 %623  ;;  %v2511_v38 = vpop.permute.xlu1 %621 }
 0x58b   :  { %v1090_v39 = vpop.permute.xlu0 %1089  ;;  %v1139_v40 = vpop.permute.xlu1 %1138 }
 0x58c   :  { %v1096_v41 = vsel %vm1094_vm15, %v1090_v39, 0  ;;  %v1144_v42 = vsel %vm1094_vm15, %v1139_v40, 0 }
 0x58d   :  { %1802 = vmatpush3.bf16.msra.mxu0 %v1096_v41  ;;  %1808 = vmatpush3.bf16.msra.mxu1 %v1144_v42 }
 0x58e   :  { %1819 = vmatprep.subr.bf16.mxu1 %v2155_v8  ;;  %1813 = vmatprep.subr.bf16.mxu0 %v2155_v8 }
 0x5cc   :  { %v757_v43 = vpop.f32.mrb[16].mxu0 }
 0x5cd   :  { %v1769_v44 = vpop.f32.mrb[17].mxu0  ;;  %v999_v46 = vsel %vm209_vm9, %v757_v43, -inf }
 0x5ce   :  { %v803_v47 = vpop.f32.mrb[8].mxu1  ;;  %1000 = vmax.xlane.f32.xlu0 %v999_v46  ;;  %v760_v51 = vpop.f32.mrb[18].mxu0 }
 0x5cf   :  { %v1770_v52 = vpop.f32.mrb[19].mxu0  ;;  %v1775_v53 = vpop.f32.mrb[9].mxu1  ;;  %v1002_v54 = vsel %vm209_vm9, %v803_v47, -inf }
 0x5d0   :  { %v806_v55 = vpop.f32.mrb[10].mxu1  ;;  %1003 = vmax.xlane.f32.xlu1 %v1002_v54  ;;  %v1652_v54 = vcombine.low %v2505_v35, %v2505_v35 }
 0x5d1   :  { %v1776_v56 = vpop.f32.mrb[11].mxu1 }
 0x5d4   :  { %v2519_v57 = vpop.f32.mrb[20].mxu0 }
 0x5d5   :  { %v1781_v58 = vpop.f32.mrb[21].mxu0  ;;  %v1005_v59 = vsel %vm209_vm9, %v2519_v57, -inf }
 0x5d6   :  { %v895_v60 = vpop.f32.mrb[12].mxu1  ;;  %1006 = vmax.xlane.f32.xlu0 %v1005_v59  ;;  %v852_v61 = vpop.f32.mrb[22].mxu0  ;;  %v1654_v59 = vcombine.low %v2511_v38, %v2511_v38 }
 0x5d7   :  { %v1782_v62 = vpop.f32.mrb[23].mxu0  ;;  %v1787_v63 = vpop.f32.mrb[13].mxu1  ;;  %v1008_v0 = vsel %vm209_vm9, %v895_v60, -inf }
 0x5d8   :  { %v898_v1 = vpop.f32.mrb[14].mxu1  ;;  %1009 = vmax.xlane.f32.xlu1 %v1008_v0 }
 0x5d9   :  { %v1788_v2 = vpop.f32.mrb[15].mxu1 }
 0x5dc   :  { %v2524_v4 = vpop.f32.mrb[24].mxu0 }
 0x5dd   :  { %v1793_v5 = vpop.f32.mrb[25].mxu0  ;;  %v1011_v6 = vsel %vm209_vm9, %v2524_v4, -inf }
 0x5de   :  { %v987_v7 = vpop.f32.mrb[16].mxu1  ;;  %1012 = vmax.xlane.f32.xlu0 %v1011_v6  ;;  %v944_v9 = vpop.f32.mrb[26].mxu0 }
 0x5df   :  { %v1794_v10 = vpop.f32.mrb[27].mxu0  ;;  %v1799_v11 = vpop.f32.mrb[17].mxu1  ;;  %v1014_v12 = vsel %vm209_vm9, %v987_v7, -inf }
 0x5e0   :  { %v990_v13 = vpop.f32.mrb[18].mxu1  ;;  %1015 = vmax.xlane.f32.xlu1 %v1014_v12 }
 0x5e1   :  { %v1800_v14 = vpop.f32.mrb[19].mxu1 }
 0x5e2   :  { %v1656_v14 = vcombine.low %v2509_v37, %v2509_v37 }
 0x5e8   :  { %v995_v3 = vpop.xlane.xlu1 %994 }
 0x5e9   :  { %v1017_v18 = vsub.f32 %v2497_v23, %v995_v3 }
 0x5ea   :  { %v998_v19 = vpop.xlane.xlu0 %997 }
 0x5eb   :  { %v1018_v17 = vsub.f32 %v2501_v26, %v998_v19  ;;  %v1025_v21 = vmul.f32 1.442695, %v1017_v18 }
 0x5ed   :  { %v1027_v20 = vmul.f32 1.442695, %v1018_v17 }
 0x5ef   :  { %1927 = vpow2.f32 %v1027_v20 }
 0x5f0   :  { %1929 = vpow2.f32 %v1025_v21 }
 0x5f1   :  { %1188 = vrot.lane.b32.xlu1 %v1646_v15, %s2162_s30 }
 0x5f4   :  { %1238 = vrot.lane.b32.xlu0 %v1648_v16, %s2162_s30 }
 0x5f9   :  { %v1928_v22 = vpop.eup %1927 }
 0x5fa   :  { %v1930_v24 = vpop.eup %1929  ;;  %v1044_v25 = vsel %vm209_vm9, %v1928_v22, 0.0 }
 0x5fb   :  { %v1041_v27 = vsel %vm209_vm9, %v1930_v24, 0.0 }
 0x613   :  { %1045 = vadd.xlane.f32.xlu0 %v1044_v25 }
 0x615   :  { %1042 = vadd.xlane.f32.xlu1 %v1041_v27 }
 0x626   :  { %1288 = vrot.lane.b32.xlu1 %v1650_v28, %s2162_s30 }
 0x65b   :  { %v1001_v26 = vpop.xlane.xlu0 %1000 }
 0x65c   :  { %v1019_v29 = vsub.f32 %v757_v43, %v1001_v26 }
 0x65d   :  { %v1004_v23 = vpop.xlane.xlu1 %1003 }
 0x65e   :  { %v1029_v30 = vmul.f32 1.442695, %v1019_v29  ;;  %v1020_v31 = vsub.f32 %v803_v47, %v1004_v23 }
 0x660   :  { %1931 = vpow2.f32 %v1029_v30  ;;  %v1031_v32 = vmul.f32 1.442695, %v1020_v31 }
 0x662   :  { %1933 = vpow2.f32 %v1031_v32 }
 0x663   :  { %v1007_v55 = vpop.xlane.xlu0 %1006 }
 0x664   :  { %v1021_v56 = vsub.f32 %v2519_v57, %v1007_v55 }
 0x665   :  { %v1010_v33 = vpop.xlane.xlu1 %1009 }
 0x666   :  { %v1022_v34 = vsub.f32 %v895_v60, %v1010_v33  ;;  %v1033_v60 = vmul.f32 1.442695, %v1021_v56 }
 0x668   :  { %v1035_v39 = vmul.f32 1.442695, %v1022_v34 }
 0x66a   :  { %v2538_v40 = vpop.eup %1931  ;;  %1935 = vpow2.f32 %v1035_v39 }
 0x66b   :  { %v1047_v41 = vsel %vm209_vm9, %v2538_v40, 0.0  ;;  %v1013_v58 = vpop.xlane.xlu0 %1012 }
 0x66c   :  { %v2542_v36 = vpop.eup %1933  ;;  %1048 = vadd.xlane.f32.xlu0 %v1047_v41  ;;  %v1023_v61 = vsub.f32 %v2524_v4, %v1013_v58 }
 0x66d   :  { %v1016_v42 = vpop.xlane.xlu1 %1015  ;;  %v1050_v43 = vsel %vm209_vm9, %v2542_v36, 0.0 }
 0x66e   :  { %v1024_v44 = vsub.f32 %v987_v7, %v1016_v42  ;;  %1051 = vadd.xlane.f32.xlu1 %v1050_v43  ;;  %v1037_v62 = vmul.f32 1.442695, %v1023_v61 }
 0x66f   :  { %v1239_v63 = vpop.permute.xlu0 %1238 }
 0x670   :  { %v1039_v46 = vmul.f32 1.442695, %v1024_v44  ;;  %v1244_v11 = vsel %vm1094_vm15, %v1239_v63, 0 }
 0x671   :  { %v1189_v35 = vpop.permute.xlu1 %1188 }
 0x672   :  { %1937 = vpow2.f32 %v1039_v46  ;;  %v1194_v13 = vsel %vm1094_vm15, %v1189_v35, 0 }
 0x673   :  { %1939 = vpow2.f32 %v1033_v60 }
 0x674   :  { %v2546_v47 = vpop.eup %1935  ;;  %1941 = vpow2.f32 %v1037_v62 }
 0x675   :  { %v1056_v51 = vsel %vm209_vm9, %v2546_v47, 0.0 }
 0x676   :  { %1057 = vadd.xlane.f32.xlu1 %v1056_v51 }
 0x67c   :  { %v2550_v52 = vpop.eup %1937 }
 0x67d   :  { %v1062_v53 = vsel %vm209_vm9, %v2550_v52, 0.0  ;;  %v2562_v0 = vpop.eup %1939 }
 0x67e   :  { %1063 = vadd.xlane.f32.xlu1 %v1062_v53  ;;  %v1053_v57 = vsel %vm209_vm9, %v2562_v0, 0.0  ;;  %v2566_v2 = vpop.eup %1941 }
 0x67f   :  { %v1059_v4 = vsel %vm209_vm9, %v2566_v2, 0.0 }
 0x682   :  { %1338 = vrot.lane.b32.xlu0 %v1652_v54, %s2162_s30 }
 0x68f   :  { %1388 = vrot.lane.b32.xlu1 %v1654_v59, %s2162_s30 }
 0x6a0   :  { %v1046_v1 = vpop.xlane.xlu0 %1045 }
 0x6a1   :  { %1943 = vrcp.f32 %v1046_v1  ;;  %1054 = vadd.xlane.f32.xlu0 %v1053_v57 }
 0x6a2   :  { %v1043_v38 = vpop.xlane.xlu1 %1042 }
 0x6a3   :  { %1945 = vrcp.f32 %v1043_v38 }
 0x6a5   :  { %1060 = vadd.xlane.f32.xlu0 %v1059_v4 }
 0x6a6   :  { %v1289_v15 = vpop.permute.xlu1 %1288 }
 0x6a7   :  { %v1294_v25 = vsel %vm1094_vm15, %v1289_v15, 0 }
 0x6ab   :  { %v1944_v5 = vpop.eup %1943 }
 0x6ac   :  { %v1074_v6 = vmul.f32 %v1944_v5, %v1928_v22 }
 0x6ad   :  { %v1946_v7 = vpop.eup %1945 }
 0x6ae   :  { %v1073_v9 = vmul.f32 %v1946_v7, %v1930_v24  ;;  %v1082_v10 = vpack.c.bf16 %v1074_v6, %v1074_v6 }
 0x6b0   :  { %1810 = vmatmul.mubr.msk.bf16.vlgmr.msra.gmra.mrb[20].mxu1 %vm209_vm9, %v1082_v10  ;;  %v1081_v12 = vpack.c.bf16 %v1073_v9, %v1073_v9  ;;  %v1925_v9 = vld [vmem:[#allocation11 + $0x10] sm:$0xff]  }
 0x6b1   :  { %1820 = vmatpush3.bf16.msra.mxu1 %v1244_v11  ;;  %1821 = vmatprep.mubr.msk.bf16.mxu1 %vm2156_vm1, %v2155_v8 }
 0x6b2   :  { %1804 = vmatmul.mubr.msk.bf16.vlgmr.msra.gmra.mrb[28].mxu0 %vm209_vm9, %v1081_v12  ;;  %1831 = vmatprep.subr.bf16.mxu1 %v2155_v8 }
 0x6b3   :  { %1814 = vmatpush3.bf16.msra.mxu0 %v1194_v13  ;;  %1815 = vmatprep.mubr.msk.bf16.mxu0 %vm2156_vm1, %v2155_v8  ;;  %v1926_v13 = vld [vmem:[#allocation11 + $0x18] sm:$0xff]  }
 0x6b4   :  { %1825 = vmatprep.subr.bf16.mxu0 %v2155_v8 }
 0x6bb   :  { %1438 = vrot.lane.b32.xlu0 %v1656_v14, %s2162_s30 }
 0x6f9   :  { %v1049_v16 = vpop.xlane.xlu0 %1048 }
 0x6fa   :  { %1947 = vrcp.f32 %v1049_v16 }
 0x6fb   :  { %v1052_v19 = vpop.xlane.xlu1 %1051 }
 0x6fc   :  { %1949 = vrcp.f32 %v1052_v19 }
 0x6fd   :  { %v1339_v24 = vpop.permute.xlu0 %1338 }
 0x6fe   :  { %v1344_v27 = vsel %vm1094_vm15, %v1339_v24, 0 }
 0x703   :  { %v1058_v3 = vpop.xlane.xlu1 %1057 }
 0x704   :  { %v1948_v17 = vpop.eup %1947  ;;  %1951 = vrcp.f32 %v1058_v3 }
 0x705   :  { %v1075_v18 = vmul.f32 %v1948_v17, %v2538_v40 }
 0x706   :  { %v1950_v20 = vpop.eup %1949 }
 0x707   :  { %v1076_v21 = vmul.f32 %v1950_v20, %v2542_v36  ;;  %v1083_v22 = vpack.c.bf16 %v1075_v18, %v1075_v18 }
 0x709   :  { %1816 = vmatmul.mubr.msk.bf16.vlgmr.msra.gmra.mrb[32].mxu0 %vm209_vm9, %v1083_v22  ;;  %v1084_v37 = vpack.c.bf16 %v1076_v21, %v1076_v21 }
 0x70a   :  { %1826 = vmatpush3.bf16.msra.mxu0 %v1294_v25  ;;  %1827 = vmatprep.mubr.msk.bf16.mxu0 %vm2156_vm1, %v2155_v8 }
 0x70b   :  { %1822 = vmatmul.mubr.msk.bf16.vlgmr.msra.gmra.mrb[24].mxu1 %vm209_vm9, %v1084_v37  ;;  %1837 = vmatprep.subr.bf16.mxu0 %v2155_v8  ;;  %v1064_v23 = vpop.xlane.xlu1 %1063 }
 0x70c   :  { %1832 = vmatpush3.bf16.msra.mxu1 %v1344_v27  ;;  %1833 = vmatprep.mubr.msk.bf16.mxu1 %vm2156_vm1, %v2155_v8  ;;  %1953 = vrcp.f32 %v1064_v23 }
 0x70d   :  { %1843 = vmatprep.subr.bf16.mxu1 %v2155_v8 }
 0x70e   :  { %v1952_v28 = vpop.eup %1951 }
 0x70f   :  { %v1078_v26 = vmul.f32 %v1952_v28, %v2546_v47  ;;  %v1389_v42 = vpop.permute.xlu1 %1388 }
 0x710   :  { %v1394_v46 = vsel %vm1094_vm15, %v1389_v42, 0 }
 0x711   :  { %v1086_v29 = vpack.c.bf16 %v1078_v26, %v1078_v26 }
 0x713   :  { %1834 = vmatmul.mubr.msk.bf16.vlgmr.msra.gmra.mrb[28].mxu1 %vm209_vm9, %v1086_v29 }
 0x714   :  { %1845 = vmatprep.mubr.msk.bf16.mxu1 %vm2156_vm1, %v2155_v8 }
 0x716   :  { %v1954_v31 = vpop.eup %1953 }
 0x717   :  { %v1080_v33 = vmul.f32 %v1954_v31, %v2550_v52 }
 0x719   :  { %v1088_v41 = vpack.c.bf16 %v1080_v33, %v1080_v33 }
 0x72e   :  { %v1055_v30 = vpop.xlane.xlu0 %1054 }
 0x72f   :  { %1955 = vrcp.f32 %v1055_v30 }
 0x732   :  { %v1061_v32 = vpop.xlane.xlu0 %1060 }
 0x733   :  { %1957 = vrcp.f32 %v1061_v32 }
 0x736   :  { %v1439_v34 = vpop.permute.xlu0 %1438 }
 0x737   :  { %v1444_v39 = vsel %vm1094_vm15, %v1439_v34, 0 }
 0x738   :  { %1844 = vmatpush3.bf16.msra.mxu1 %v1444_v39 }
 0x739   :  { %v1956_v40 = vpop.eup %1955 }
 0x73a   :  { %v1077_v36 = vmul.f32 %v1956_v40, %v2562_v0 }
 0x73b   :  { %1846 = vmatmul.mubr.msk.bf16.vlgmr.msra.gmra.mrb[32].mxu1 %vm209_vm9, %v1088_v41 }
 0x73c   :  { %v1085_v43 = vpack.c.bf16 %v1077_v36, %v1077_v36  ;;  %v1658_v36 = vld [vmem:[#allocation13 + $0x5] ss:$0 sm:$0xff] }
 0x73d   :  { %v1958_v44 = vpop.eup %1957 }
 0x73e   :  { %1828 = vmatmul.mubr.msk.bf16.vlgmr.msra.gmra.mrb[36].mxu0 %vm209_vm9, %v1085_v43  ;;  %v1079_v47 = vmul.f32 %v1958_v44, %v2566_v2 }
 0x73f   :  { %1838 = vmatpush3.bf16.msra.mxu0 %v1394_v46  ;;  %1839 = vmatprep.mubr.msk.bf16.mxu0 %vm2156_vm1, %v2155_v8 }
 0x740   :  { %1849 = vmatprep.subr.bf16.mxu0 %v2155_v8  ;;  %v1087_v51 = vpack.c.bf16 %v1079_v47, %v1079_v47 }
 0x746   :  { %1840 = vmatmul.mubr.msk.bf16.vlgmr.msra.gmra.mrb[40].mxu0 %vm209_vm9, %v1087_v51 }
 0x747   :  { %1853 = vmatprep.mubr.msk.bf16.mxu0 %vm2156_vm1, %v2155_v8  ;;  %1850 = vmatpush3.bf16.msra.mxu0 %v1925_v9 }
 0x748   :  { %1851 = vmatprep.subr.bf16.mxu0 %v2155_v8 }
 0x74b   :  { %1852 = vmatpush3.bf16.msra.mxu0 %v1926_v13 }
 0x783   :  { %v1180_v52 = vpop.f32.mrb[20].mxu1 }
 0x784   :  { %v1811_v53 = vpop.f32.mrb[21].mxu1 }
 0x785   :  { %v1132_v54 = vpop.f32.mrb[28].mxu0  ;;  %v1183_v55 = vpop.f32.mrb[22].mxu1 }
 0x786   :  { %v1805_v56 = vpop.f32.mrb[29].mxu0  ;;  %v1812_v58 = vpop.f32.mrb[23].mxu1 }
 0x787   :  { %v1135_v59 = vpop.f32.mrb[30].mxu0 }
 0x788   :  { %v1806_v60 = vpop.f32.mrb[31].mxu0 }
 0x7dc   :  { %v1230_v61 = vpop.f32.mrb[32].mxu0 }
 0x7dd   :  { %v1817_v62 = vpop.f32.mrb[33].mxu0 }
 0x7de   :  { %v1233_v63 = vpop.f32.mrb[34].mxu0  ;;  %v1280_v0 = vpop.f32.mrb[24].mxu1 }
 0x7df   :  { %v1899_v35 = vpack.i.bf16 %v1280_v0, %v1230_v61  ;;  %v1818_v1 = vpop.f32.mrb[35].mxu0  ;;  %v1823_v57 = vpop.f32.mrb[25].mxu1 }
 0x7e0   :  { %v1283_v2 = vpop.f32.mrb[26].mxu1 }
 0x7e1   :  { %v1824_v38 = vpop.f32.mrb[27].mxu1  ;;  %1900 = vrot.lane.b32.xlu1 %v1899_v35, %s2157_s6 }
 0x7e6   :  { %v1380_v4 = vpop.f32.mrb[28].mxu1 }
 0x7e7   :  { %v1835_v5 = vpop.f32.mrb[29].mxu1 }
 0x7e8   :  { %v1383_v6 = vpop.f32.mrb[30].mxu1 }
 0x7e9   :  { %v1836_v7 = vpop.f32.mrb[31].mxu1 }
 0x80e   :  { %v1480_v10 = vpop.f32.mrb[32].mxu1 }
 0x80f   :  { %v1847_v11 = vpop.f32.mrb[33].mxu1 }
 0x810   :  { %v1483_v12 = vpop.f32.mrb[34].mxu1 }
 0x811   :  { %v1330_v14 = vpop.f32.mrb[36].mxu0  ;;  %v1848_v15 = vpop.f32.mrb[35].mxu1 }
 0x812   :  { %v1904_v16 = vpack.i.bf16 %v1380_v4, %v1330_v14  ;;  %v1829_v19 = vpop.f32.mrb[37].mxu0 }
 0x813   :  { %v1333_v3 = vpop.f32.mrb[38].mxu0 }
 0x814   :  { %1905 = vrot.lane.b32.xlu0 %v1904_v16, %s2163_s27  ;;  %v1830_v17 = vpop.f32.mrb[39].mxu0 }
 0x819   :  { %v1430_v18 = vpop.f32.mrb[40].mxu0 }
 0x81a   :  { %v1909_v20 = vpack.i.bf16 %v1480_v10, %v1430_v18  ;;  %v1841_v21 = vpop.f32.mrb[41].mxu0 }
 0x81b   :  { %v1433_v22 = vpop.f32.mrb[42].mxu0 }
 0x81c   :  { %1910 = vrot.lane.b32.xlu1 %v1909_v20, %s2164_s17  ;;  %v1842_v8 = vpop.f32.mrb[43].mxu0 }
 0x853   :  { %v1901_v24 = vpop.permute.xlu1 %1900 }
 0x854   :  { %v1903_v37 = vunpack.i.h.bf16 %v1901_v24  ;;  %v1902_v27 = vunpack.i.l.bf16 %v1901_v24 }
 0x856   :  { %v1511_v23 = vsel %vm209_vm9, %v1180_v52, %v1903_v37  ;;  %v1510_v30 = vsel %vm209_vm9, %v1132_v54, %v1902_v27 }
 0x886   :  { %v1906_v25 = vpop.permute.xlu0 %1905 }
 0x887   :  { %v1908_v28 = vunpack.i.h.bf16 %v1906_v25  ;;  %v1907_v26 = vunpack.i.l.bf16 %v1906_v25 }
 0x889   :  { %v1513_v33 = vsel %vm442_vm11, %v1511_v23, %v1908_v28  ;;  %v1512_v34 = vsel %vm442_vm11, %v1510_v30, %v1907_v26 }
 0x88e   :  { %v1911_v29 = vpop.permute.xlu1 %1910 }
 0x88f   :  { %v1913_v31 = vunpack.i.h.bf16 %v1911_v29  ;;  %v1912_v32 = vunpack.i.l.bf16 %v1911_v29 }
 0x891   :  { %v1516_v39 = vsel %vm1514_vm0, %v1513_v33, %v1913_v31  ;;  %v1515_v40 = vsel %vm1514_vm0, %v1512_v34, %v1912_v32 }
 0x892   :  { %v1522_v41 = vpack.c.bf16 %v1516_v39, %v1515_v40 }
 0x894   :  { %1854 = vmatmul.mubr.msk.bf16.vlgmr.msra.gmra.mrb[44].mxu0 %vm313_vm12, %v1522_v41 }
 0x967   :  { %v1577_v42 = vpop.f32.mrb[44].mxu0 }
 0x968   :  { %v1578_v43 = vadd.f32 %v1658_v36, %v1577_v42  ;;  %v1855_v44 = vpop.f32.mrb[45].mxu0 }
 0x969   :  { %v1580_v46 = vpop.f32.mrb[46].mxu0 }
 0x96a   :  { %v1584_v47 = vadd.f32 %v1578_v43, %v425_v49  ;;  %v1581_v51 = vadd.f32 %v1658_v36, %v1580_v46  ;;  %v1856_v52 = vpop.f32.mrb[47].mxu0 }
 0x96c   :  { %1586 = vst.msk [vmem:[#allocation14] sm:$0xff] %vm313_vm12, %v1584_v47  ;;  %v1585_v53 = vadd.f32 %v1581_v51, %v426_v50 }
 0x96e   :  { %1587 = vst.msk [vmem:[#allocation14 + $0x8] sm:$0xff] %vm313_vm12, %v1585_v53 }
 0x96f   :  { %2124 = shalt.err (!%p2121_p4)
}
 0x970   :  { %s2125_s23 = scalar_lea.hbm %s2645_s7, 256 }
 0x971   :  { %p2126_p5 = scmp.ne.s32.totalorder %s2645_s7, %s2125_s23  ;;  %p2129_p6 = scmp.lt.u32.totalorder %s2125_s23, %s2645_s7 }
 0x973   :  { %p2131_p7 = pnand %p2129_p6, %p2126_p5 }
 0x975   :  { %2134 = shalt.err (!%p2131_p7)
}
 0x976   :  { %s2166_s25 = smov 128  }
 0x977   :  { %1599 = dma.vmem_to_hbm [thread:$0]  %s1594_s19, 256, %s2645_s7, [#allocation4], %s2166_s25, %s2166_s25, %s2157_s6  }
 0x978   :  { %2143 = dma.done.wait [#allocation4], 256  }
 0x979   :  { %2144 = vsyncadd [#allocation4], 4294967040 }
 0x97a   :  { %1603 = vsyncpa [#allocation3], 1 }
 0x97b   :  { %1604 = vsyncpa [#allocation6], 1 }
 0x97c   :  { %1605 = vsyncpa [#allocation9], 1 }
 0x97d   :  { %1606 = vsyncpa [#allocation12], 1 }
 0x97e   :  { %1607 = vsyncpa [#allocation4], 1 }

</bundles_post_ra>
